<compile_context>
chip_gen: v5e
topology: v5e:2x2
jax: 0.10.0
libtpu: 0.0.40
codegen_flags: <defaults>
</compile_context>

<pallas_src>
import functools

import jax
import jax.numpy as jnp
from jax.experimental import pallas as pl
from jax.experimental.pallas import tpu as pltpu

# taps of a 3x3 window excluding the center, in (i, j) row-major order
_TAPS = tuple((i, j) for i in range(3) for j in range(3) if not (i == 1 and j == 1))


# ---------------------------------------------------------------------------
# Kernel
# ---------------------------------------------------------------------------
def cgb_kernel(x_ref, w1_ref, slabA_ref, wfc1l_ref, wfc1s_ref, wfc2l_ref,
               wfc2s_ref, bfc1_ref, masks_ref, pool_ref, expand_ref, o_ref,
               *, W, dil_sur, add):
    """One batch-tile (Bt lane-concatenated images) per grid step.

    x_ref     : (C_in, L)  f32   L = Bt*H*W; channels on sublanes, pixels
                                 (image-major, row-major) on lanes
    w1_ref    : (n, C_in)  bf16  1x1-conv weight (PyTorch (n, nIn, 1, 1))
    slabA_ref : (n, 28)    f32   packed per-n-channel params:
                 0 s1, 1 b1 (folded BN after conv1x1)
                 2 bloc, 3 bsur (depthwise conv biases)
                 4 s2_loc, 5 b2_loc, 6 s2_sur, 7 b2_sur (folded BN(nOut))
                 8 bfc2_loc, 9 bfc2_sur (FGlo second-FC bias halves)
                 10..18 wloc taps, 19..27 wsur taps (row-major 3x3)
    wfc1l_ref : (hid, n)   f32   FGlo FC1 weight, loc-channel columns
    wfc1s_ref : (hid, n)   f32   FGlo FC1 weight, sur-channel columns
    wfc2l_ref : (n, hid)   f32   FGlo FC2 weight rows for loc channels
    wfc2s_ref : (n, hid)   f32   FGlo FC2 weight rows for sur channels
    bfc1_ref  : (hid, 1)   f32   FGlo FC1 bias
    masks_ref : (16, L)    f32   boundary masks, 8 taps x {dil=1, dil=dil_sur}
    pool_ref  : (L, Bt)    f32   per-image mean-pool matrix (1/HW entries)
    expand_ref: (Bt, L)    f32   per-image gate-broadcast matrix (1.0 entries)
    o_ref     : (nOut, L)  f32   output block
    """
    n = w1_ref.shape[0]                        # nOut // 2
    L = x_ref.shape[1]
    Bt = pool_ref.shape[1]

    slabA = slabA_ref[...]                     # keep packed params in vregs

    # ---- conv1x1 on the MXU (bf16 in, f32 acc) + folded BN + SiLU ----------
    y = jnp.dot(w1_ref[...], x_ref[...].astype(jnp.bfloat16),
                preferred_element_type=jnp.float32)            # (n, L)
    y = y * slabA[:, 0:1] + slabA[:, 1:2]
    y = y * jax.nn.sigmoid(y)

    def dw3x3(dil, tap_col0, bias_col, mask_row0):
        """Depthwise 3x3, dilation `dil`, "same" padding, + conv bias."""
        # center tap initialises the accumulator, fused with the conv bias
        terms = [y * slabA[:, tap_col0 + 4:tap_col0 + 5]
                 + slabA[:, bias_col:bias_col + 1]]
        for t, (i, j) in enumerate(_TAPS):
            di = (i - 1) * dil
            dj = (j - 1) * dil
            # value at flat index k + di*W + dj  ==  roll by -(di*W + dj)
            sh = (-(di * W + dj)) % L
            shifted = pltpu.roll(y, sh, axis=1)
            m = masks_ref[mask_row0 + t:mask_row0 + t + 1, :]   # (1, L) 0/1 f32
            c = tap_col0 + 3 * i + j
            terms.append((shifted * m) * slabA[:, c:c + 1])
        # pairwise-tree accumulation: shallower dependency chain than a serial
        # 8-deep add chain, lets the 4 VALU slots co-issue.
        while len(terms) > 1:
            nxt = [terms[a] + terms[a + 1] for a in range(0, len(terms) - 1, 2)]
            if len(terms) % 2:
                nxt.append(terms[-1])
            terms = nxt
        return terms[0]

    loc = dw3x3(1, 10, 2, 0)                   # F_loc: 3x3, dilation 1, + bias
    sur = dw3x3(dil_sur, 19, 3, 8)             # F_sur: 3x3, dilation 2, + bias

    # ---- folded BatchNorm(nOut) + SiLU, applied per channel half -----------
    loc = loc * slabA[:, 4:5] + slabA[:, 5:6]
    loc = loc * jax.nn.sigmoid(loc)
    sur = sur * slabA[:, 6:7] + slabA[:, 7:8]
    sur = sur * jax.nn.sigmoid(sur)

    # ---- FGlo (per image): avg-pool -> FC -> ReLU -> FC -> sigmoid -> scale
    if Bt == 1:
        gp_loc = jnp.mean(loc, axis=1, keepdims=True)          # (n, 1)
        gp_sur = jnp.mean(sur, axis=1, keepdims=True)
    else:
        pool = pool_ref[...]
        gp_loc = jnp.dot(loc, pool, preferred_element_type=jnp.float32)  # (n, Bt)
        gp_sur = jnp.dot(sur, pool, preferred_element_type=jnp.float32)

    h = (jnp.dot(wfc1l_ref[...], gp_loc, preferred_element_type=jnp.float32)
         + jnp.dot(wfc1s_ref[...], gp_sur, preferred_element_type=jnp.float32)
         + bfc1_ref[...])                                       # (hid, Bt)
    h = jnp.maximum(h, 0.0)
    g_loc = jax.nn.sigmoid(
        jnp.dot(wfc2l_ref[...], h, preferred_element_type=jnp.float32)
        + slabA[:, 8:9])                                        # (n, Bt)
    g_sur = jax.nn.sigmoid(
        jnp.dot(wfc2s_ref[...], h, preferred_element_type=jnp.float32)
        + slabA[:, 9:10])                                       # (n, Bt)

    if Bt == 1:
        gl, gs = g_loc, g_sur                  # (n,1) broadcasts over L lanes
    else:
        ex = expand_ref[...]
        gl = jnp.dot(g_loc, ex, preferred_element_type=jnp.float32)  # (n, L)
        gs = jnp.dot(g_sur, ex, preferred_element_type=jnp.float32)

    # ---- gate + residual, written into the two sublane halves --------------
    out_loc = loc * gl
    out_sur = sur * gs
    if add:                                    # requires nIn == nOut
        out_loc = out_loc + x_ref[0:n, :]      # re-read; f32 x not held live
        out_sur = out_sur + x_ref[n:2 * n, :]
    o_ref[0:n, :] = out_loc.astype(o_ref.dtype)
    o_ref[n:2 * n, :] = out_sur.astype(o_ref.dtype)


# ---------------------------------------------------------------------------
# Wrapper
# ---------------------------------------------------------------------------
def _choose_batch_tile(B, C_in, nOut, HW, vmem_budget=12 * 1024 * 1024):
    """Pick images-per-grid-step (Bt).

    Keeps >= 2 grid steps when B >= 2 (both v7x TensorCores busy) and caps the
    per-step VMEM footprint under ~12 MiB so it fits v5e's 16 MiB scoped-VMEM
    default and stays far below v7x's 64 MiB physical VMEM.  The roll-based
    halo trick needs each (C, Bt*HW) slab fully resident, so the cap scales
    down automatically as H*W grows.
    """
    n = nOut // 2
    io_bytes = 2 * (C_in + nOut) * HW * 4      # x + out, double-buffered
    tmp_bytes = 6 * n * HW * 4                 # y/loc/sur/roll temps (f32)
    per_img = io_bytes + tmp_bytes
    bt_cap = max(1, vmem_budget // per_img)
    target_steps = 2 if B >= 2 else 1
    return max(1, min(bt_cap, -(-B // target_steps)))


def context_guided_block(x_nchw, params, *, add=True, dilation_rate=2):
    """x_nchw: (B, nIn, H, W) float32.  Returns (B, nOut, H, W) float32."""
    B, C_in, H, W = x_nchw.shape
    n = params['w1m'].shape[0]
    nOut = 2 * n
    HW = H * W
    if add and C_in != nOut:
        raise ValueError("residual learning (add=True) requires nIn == nOut")

    Bt = _choose_batch_tile(B, C_in, nOut, HW)
    G = -(-B // Bt)                            # grid length
    Bp = G * Bt
    L = Bt * HW

    # flatten spatial; pad batch to a multiple of Bt (padded rows discarded)
    x = x_nchw.reshape(B, C_in, HW).astype(jnp.float32)
    if Bp != B:
        x = jnp.concatenate(
            [x, jnp.zeros((Bp - B, C_in, HW), jnp.float32)], axis=0)
    # lane-concatenate Bt images per grid step: (G, C_in, Bt*HW)
    xg = x.reshape(G, Bt, C_in, HW).transpose(0, 2, 1, 3).reshape(G, C_in, L)

    # per-tap boundary masks (zero reads outside each HxW image), tiled across
    # the Bt lane-concatenated images -> rolls cannot leak across images.
    ar = jnp.arange(HW, dtype=jnp.int32)
    hrow, wrow = ar // W, ar % W
    rows = []
    for dil in (1, dilation_rate):
        for (i, j) in _TAPS:
            di, dj = (i - 1) * dil, (j - 1) * dil
            m = jnp.ones((HW,), jnp.bool_)
            if di > 0:
                m = m & (hrow < H - di)
            if di < 0:
                m = m & (hrow >= -di)
            if dj > 0:
                m = m & (wrow < W - dj)
            if dj < 0:
                m = m & (wrow >= -dj)
            rows.append(m)
    masks = jnp.tile(jnp.stack(rows).astype(jnp.float32), (1, Bt))     # (16, L)

    # per-image mean-pool / gate-broadcast matrices (segmented ops on the MXU)
    img_id = jnp.arange(L, dtype=jnp.int32) // HW
    eye = (img_id[:, None] == jnp.arange(Bt, dtype=jnp.int32)[None, :])
    pool = eye.astype(jnp.float32) / float(HW)                         # (L, Bt)
    expand = eye.T.astype(jnp.float32)                                 # (Bt, L)

    kernel = functools.partial(cgb_kernel, W=W, dil_sur=dilation_rate, add=add)

    def _full(a):
        return pl.BlockSpec(a.shape, lambda g, _nd=a.ndim: (0,) * _nd)

    weights = (params['w1m'], params['slabA'], params['wfc1l'], params['wfc1s'],
               params['wfc2l'], params['wfc2s'], params['bfc1'])

    out = pl.pallas_call(
        kernel,
        out_shape=jax.ShapeDtypeStruct((G, nOut, L), jnp.float32),
        grid=(G,),
        in_specs=[pl.BlockSpec((None, C_in, L), lambda g: (g, 0, 0))]
                 + [_full(w) for w in weights]
                 + [_full(masks), _full(pool), _full(expand)],
        out_specs=pl.BlockSpec((None, nOut, L), lambda g: (g, 0, 0)),
        # weight/mask blocks map to the same indices every step -> DMA'd once
        compiler_params=pltpu.CompilerParams(
            dimension_semantics=("parallel",)),
    )(xg, *weights, masks, pool, expand)

    out = out.reshape(G, nOut, Bt, HW).transpose(0, 2, 1, 3).reshape(Bp, nOut, HW)
    return out[:B].reshape(B, nOut, H, W)


# ---------------------------------------------------------------------------
# Parameters (synthetic; BatchNorms folded to inference-mode scale/bias)
# ---------------------------------------------------------------------------
def make_params(key, nIn, nOut, reduction=16):
    n = nOut // 2
    hid = nOut // reduction
    assert hid >= 1, "nOut // reduction must be >= 1"
    eps = 1e-5
    ks = jax.random.split(key, 17)

    def nrm(k, shp, s=0.1):
        return jax.random.normal(k, shp, jnp.float32) * s

    # conv1x1: PyTorch weight (n, nIn, 1, 1) -> (n, nIn), no bias (Conv)
    w1 = nrm(ks[0], (n, nIn), 0.2)
    g1 = 1.0 + nrm(ks[1], (n,)); be1 = nrm(ks[2], (n,))
    m1 = nrm(ks[3], (n,));       v1 = 1.0 + jnp.abs(nrm(ks[4], (n,)))
    s1 = g1 / jnp.sqrt(v1 + eps); b1 = be1 - m1 * s1

    # depthwise 3x3: PyTorch weight (n, 1, 3, 3) -> (n, 9), row-major taps
    wloc = nrm(ks[5], (n, 9), 0.2); bloc = nrm(ks[6], (n,))
    wsur = nrm(ks[7], (n, 9), 0.2); bsur = nrm(ks[8], (n,))

    g2 = 1.0 + nrm(ks[9], (nOut,)); be2 = nrm(ks[10], (nOut,))
    m2 = nrm(ks[11], (nOut,));      v2 = 1.0 + jnp.abs(nrm(ks[12], (nOut,)))
    s2 = g2 / jnp.sqrt(v2 + eps);   b2 = be2 - m2 * s2

    # FGlo: Linear(nOut->hid).weight=(hid,nOut); Linear(hid->nOut).weight=(nOut,hid)
    wfc1 = nrm(ks[13], (hid, nOut), 0.2); bfc1 = nrm(ks[14], (hid,))
    wfc2 = nrm(ks[15], (nOut, hid), 0.2); bfc2 = nrm(ks[16], (nOut,))

    col = lambda v: v.reshape(-1, 1)
    slabA = jnp.concatenate(
        [col(s1), col(b1), col(bloc), col(bsur),
         col(s2[:n]), col(b2[:n]), col(s2[n:]), col(b2[n:]),
         col(bfc2[:n]), col(bfc2[n:]),
         wloc, wsur], axis=1).astype(jnp.float32)              # (n, 28)

    return dict(
        w1m=w1.astype(jnp.bfloat16),           # MXU input dtype (f32 acc)
        slabA=slabA,
        wfc1l=wfc1[:, :n].astype(jnp.float32),   # (hid, n)
        wfc1s=wfc1[:, n:].astype(jnp.float32),   # (hid, n)
        wfc2l=wfc2[:n, :].astype(jnp.float32),   # (n, hid)
        wfc2s=wfc2[n:, :].astype(jnp.float32),   # (n, hid)
        bfc1=bfc1.reshape(hid, 1).astype(jnp.float32),
        # raw copies for the pure-JAX reference below
        raw=dict(w1=w1, s1=s1, b1=b1, wloc=wloc, bloc=bloc, wsur=wsur,
                 bsur=bsur, s2=s2, b2=b2, wfc1=wfc1, bfc1=bfc1,
                 wfc2=wfc2, bfc2=bfc2),
    )


# ---------------------------------------------------------------------------
# Pure-JAX reference (NCHW) for correctness validation
# ---------------------------------------------------------------------------
def reference_cgb(x, r):
    B, C, H, W = x.shape
    # 1x1 conv (bf16 inputs, matching the kernel's MXU dtype) + folded BN + SiLU
    y = jnp.einsum('oc,bchw->bohw',
                   r['w1'].astype(jnp.bfloat16), x.astype(jnp.bfloat16),
                   preferred_element_type=jnp.float32)
    y = y * r['s1'].reshape(1, -1, 1, 1) + r['b1'].reshape(1, -1, 1, 1)
    y = y * jax.nn.sigmoid(y)

    def dw(yv, w9, bias, dil):
        yp = jnp.pad(yv, ((0, 0), (0, 0), (dil, dil), (dil, dil)))
        out = jnp.zeros_like(yv)
        for i in range(3):
            for j in range(3):
                w = w9[:, 3 * i + j].reshape(1, -1, 1, 1)
                out = out + yp[:, :, i * dil:i * dil + H, j * dil:j * dil + W] * w
        return out + bias.reshape(1, -1, 1, 1)

    loc = dw(y, r['wloc'], r['bloc'], 1)
    sur = dw(y, r['wsur'], r['bsur'], 2)
    joi = jnp.concatenate([loc, sur], axis=1)
    joi = joi * r['s2'].reshape(1, -1, 1, 1) + r['b2'].reshape(1, -1, 1, 1)
    joi = joi * jax.nn.sigmoid(joi)
    gp = jnp.mean(joi, axis=(2, 3))                            # (B, nOut)
    h = jnp.maximum(gp @ r['wfc1'].T + r['bfc1'], 0.0)         # (B, hid)
    g = jax.nn.sigmoid(h @ r['wfc2'].T + r['bfc2'])            # (B, nOut)
    return joi * g[:, :, None, None] + x


# ---------------------------------------------------------------------------
if __name__ == "__main__":
    key = jax.random.PRNGKey(0)
    kx, kp = jax.random.split(key)
    # nIn == nOut == 32 so the residual add (add=True) is valid; reduction=16 -> hid=2.
    C, H, W = 32, 16, 16
    params = make_params(kp, nIn=C, nOut=C, reduction=16)
    fwd = jax.jit(functools.partial(context_guided_block, add=True))

    # B=2 -> Bt=1, grid=(2,)  (both v7x cores);  B=8 -> Bt=4, grid=(2,)
    for B in (2, 8):
        x = jax.random.normal(jax.random.fold_in(kx, B), (B, C, H, W),
                              jnp.float32)
        out = jax.block_until_ready(fwd(x, params))
        assert out.shape == (B, C, H, W) and out.dtype == jnp.float32
        ref = jax.block_until_ready(reference_cgb(x, params['raw']))
        err = float(jnp.max(jnp.abs(out - ref)))
        assert err < 2e-3, f"B={B}: kernel/reference mismatch, max abs err = {err}"

    print("KERNEL_OK")
</pallas_src>

<mosaic_0001>
module attributes {stable_mosaic.version = 11 : i64} {
  func.func @cgb_kernel(%arg0: i32, %arg1: memref<1x32x256xf32, #tpu.memory_space<vmem>>, %arg2: memref<16x32xbf16, #tpu.memory_space<vmem>>, %arg3: memref<16x28xf32, #tpu.memory_space<vmem>>, %arg4: memref<2x16xf32, #tpu.memory_space<vmem>>, %arg5: memref<2x16xf32, #tpu.memory_space<vmem>>, %arg6: memref<16x2xf32, #tpu.memory_space<vmem>>, %arg7: memref<16x2xf32, #tpu.memory_space<vmem>>, %arg8: memref<2x1xf32, #tpu.memory_space<vmem>>, %arg9: memref<16x256xf32, #tpu.memory_space<vmem>>, %arg10: memref<256x1xf32, #tpu.memory_space<vmem>>, %arg11: memref<1x256xf32, #tpu.memory_space<vmem>>, %arg12: memref<1x32x256xf32, #tpu.memory_space<vmem>>) attributes {dimension_semantics = [#tpu.dimension_semantics<parallel>], iteration_bounds = array<i64: 2>, scalar_prefetch = 0 : i64, scratch_operands = 0 : i64, tpu.core_type = #tpu.core_type<tc>, window_params = [{transform_indices = @transform_0, window_bounds = array<i64: 1, 32, 256>}, {pipeline_mode = #tpu.pipeline_mode<synchronous>, transform_indices = @transform_1, window_bounds = array<i64: 16, 32>}, {pipeline_mode = #tpu.pipeline_mode<synchronous>, transform_indices = @transform_2, window_bounds = array<i64: 16, 28>}, {pipeline_mode = #tpu.pipeline_mode<synchronous>, transform_indices = @transform_3, window_bounds = array<i64: 2, 16>}, {pipeline_mode = #tpu.pipeline_mode<synchronous>, transform_indices = @transform_4, window_bounds = array<i64: 2, 16>}, {pipeline_mode = #tpu.pipeline_mode<synchronous>, transform_indices = @transform_5, window_bounds = array<i64: 16, 2>}, {pipeline_mode = #tpu.pipeline_mode<synchronous>, transform_indices = @transform_6, window_bounds = array<i64: 16, 2>}, {pipeline_mode = #tpu.pipeline_mode<synchronous>, transform_indices = @transform_7, window_bounds = array<i64: 2, 1>}, {pipeline_mode = #tpu.pipeline_mode<synchronous>, transform_indices = @transform_8, window_bounds = array<i64: 16, 256>}, {pipeline_mode = #tpu.pipeline_mode<synchronous>, transform_indices = @transform_9, window_bounds = array<i64: 256, 1>}, {pipeline_mode = #tpu.pipeline_mode<synchronous>, transform_indices = @transform_10, window_bounds = array<i64: 1, 256>}, {transform_indices = @transform_11, window_bounds = array<i64: 1, 32, 256>}]} {
    %c0 = arith.constant 0 : index
    %c0_0 = arith.constant 0 : index
    %0 = vector.load %arg3[%c0, %c0_0] : memref<16x28xf32, #tpu.memory_space<vmem>>, vector<16x28xf32>
    %c0_1 = arith.constant 0 : index
    %c0_2 = arith.constant 0 : index
    %1 = vector.load %arg2[%c0_1, %c0_2] : memref<16x32xbf16, #tpu.memory_space<vmem>>, vector<16x32xbf16>
    %c0_3 = arith.constant 0 : index
    %c0_4 = arith.constant 0 : index
    %c0_5 = arith.constant 0 : index
    %2 = vector.load %arg1[%c0_3, %c0_4, %c0_5] : memref<1x32x256xf32, #tpu.memory_space<vmem>>, vector<1x32x256xf32>
    %3 = vector.shape_cast %2 : vector<1x32x256xf32> to vector<32x256xf32>
    %4 = arith.truncf %3 : vector<32x256xf32> to vector<32x256xbf16>
    %cst = arith.constant dense<0.000000e+00> : vector<16x256xf32>
    %5 = tpu.matmul %1, %4, %cst {dimension_numbers = #tpu.dot_dimension_numbers<[1], [0], [0], [1], [0, 0, 1, 1], [], []>} : vector<16x32xbf16>, vector<32x256xbf16>, vector<16x256xf32> -> vector<16x256xf32>
    %6 = vector.extract_strided_slice %0 {offsets = [0, 0], sizes = [16, 1], strides = [1, 1]} : vector<16x28xf32> to vector<16x1xf32>
    %7 = vector.broadcast %6 : vector<16x1xf32> to vector<16x256xf32>
    %8 = arith.mulf %5, %7 : vector<16x256xf32>
    %9 = vector.extract_strided_slice %0 {offsets = [0, 1], sizes = [16, 1], strides = [1, 1]} : vector<16x28xf32> to vector<16x1xf32>
    %10 = vector.broadcast %9 : vector<16x1xf32> to vector<16x256xf32>
    %11 = arith.addf %8, %10 : vector<16x256xf32>
    %12 = arith.negf %11 : vector<16x256xf32>
    %13 = math.exp %12 : vector<16x256xf32>
    %cst_6 = arith.constant 1.000000e+00 : f32
    %14 = vector.broadcast %cst_6 : f32 to vector<16x256xf32>
    %15 = arith.addf %14, %13 : vector<16x256xf32>
    %16 = arith.divf %14, %15 : vector<16x256xf32>
    %17 = arith.mulf %11, %16 : vector<16x256xf32>
    %18 = vector.extract_strided_slice %0 {offsets = [0, 14], sizes = [16, 1], strides = [1, 1]} : vector<16x28xf32> to vector<16x1xf32>
    %19 = vector.broadcast %18 : vector<16x1xf32> to vector<16x256xf32>
    %20 = arith.mulf %17, %19 : vector<16x256xf32>
    %21 = vector.extract_strided_slice %0 {offsets = [0, 2], sizes = [16, 1], strides = [1, 1]} : vector<16x28xf32> to vector<16x1xf32>
    %22 = vector.broadcast %21 : vector<16x1xf32> to vector<16x256xf32>
    %23 = arith.addf %20, %22 : vector<16x256xf32>
    %c17_i32 = arith.constant 17 : i32
    %24 = tpu.dynamic_rotate %17 by %c17_i32 dim 1 : vector<16x256xf32>, i32 -> vector<16x256xf32>
    %c0_7 = arith.constant 0 : index
    %c0_8 = arith.constant 0 : index
    %25 = vector.load %arg9[%c0_7, %c0_8] : memref<16x256xf32, #tpu.memory_space<vmem>>, vector<1x256xf32>
    %26 = vector.broadcast %25 : vector<1x256xf32> to vector<16x256xf32>
    %27 = arith.mulf %24, %26 : vector<16x256xf32>
    %28 = vector.extract_strided_slice %0 {offsets = [0, 10], sizes = [16, 1], strides = [1, 1]} : vector<16x28xf32> to vector<16x1xf32>
    %29 = vector.broadcast %28 : vector<16x1xf32> to vector<16x256xf32>
    %30 = arith.mulf %27, %29 : vector<16x256xf32>
    %c16_i32 = arith.constant 16 : i32
    %31 = tpu.dynamic_rotate %17 by %c16_i32 dim 1 : vector<16x256xf32>, i32 -> vector<16x256xf32>
    %c1 = arith.constant 1 : index
    %c0_9 = arith.constant 0 : index
    %32 = vector.load %arg9[%c1, %c0_9] : memref<16x256xf32, #tpu.memory_space<vmem>>, vector<1x256xf32>
    %33 = vector.broadcast %32 : vector<1x256xf32> to vector<16x256xf32>
    %34 = arith.mulf %31, %33 : vector<16x256xf32>
    %35 = vector.extract_strided_slice %0 {offsets = [0, 11], sizes = [16, 1], strides = [1, 1]} : vector<16x28xf32> to vector<16x1xf32>
    %36 = vector.broadcast %35 : vector<16x1xf32> to vector<16x256xf32>
    %37 = arith.mulf %34, %36 : vector<16x256xf32>
    %c15_i32 = arith.constant 15 : i32
    %38 = tpu.dynamic_rotate %17 by %c15_i32 dim 1 : vector<16x256xf32>, i32 -> vector<16x256xf32>
    %c2 = arith.constant 2 : index
    %c0_10 = arith.constant 0 : index
    %39 = vector.load %arg9[%c2, %c0_10] : memref<16x256xf32, #tpu.memory_space<vmem>>, vector<1x256xf32>
    %40 = vector.broadcast %39 : vector<1x256xf32> to vector<16x256xf32>
    %41 = arith.mulf %38, %40 : vector<16x256xf32>
    %42 = vector.extract_strided_slice %0 {offsets = [0, 12], sizes = [16, 1], strides = [1, 1]} : vector<16x28xf32> to vector<16x1xf32>
    %43 = vector.broadcast %42 : vector<16x1xf32> to vector<16x256xf32>
    %44 = arith.mulf %41, %43 : vector<16x256xf32>
    %c1_i32 = arith.constant 1 : i32
    %45 = tpu.dynamic_rotate %17 by %c1_i32 dim 1 : vector<16x256xf32>, i32 -> vector<16x256xf32>
    %c3 = arith.constant 3 : index
    %c0_11 = arith.constant 0 : index
    %46 = vector.load %arg9[%c3, %c0_11] : memref<16x256xf32, #tpu.memory_space<vmem>>, vector<1x256xf32>
    %47 = vector.broadcast %46 : vector<1x256xf32> to vector<16x256xf32>
    %48 = arith.mulf %45, %47 : vector<16x256xf32>
    %49 = vector.extract_strided_slice %0 {offsets = [0, 13], sizes = [16, 1], strides = [1, 1]} : vector<16x28xf32> to vector<16x1xf32>
    %50 = vector.broadcast %49 : vector<16x1xf32> to vector<16x256xf32>
    %51 = arith.mulf %48, %50 : vector<16x256xf32>
    %c255_i32 = arith.constant 255 : i32
    %52 = tpu.dynamic_rotate %17 by %c255_i32 dim 1 : vector<16x256xf32>, i32 -> vector<16x256xf32>
    %c4 = arith.constant 4 : index
    %c0_12 = arith.constant 0 : index
    %53 = vector.load %arg9[%c4, %c0_12] : memref<16x256xf32, #tpu.memory_space<vmem>>, vector<1x256xf32>
    %54 = vector.broadcast %53 : vector<1x256xf32> to vector<16x256xf32>
    %55 = arith.mulf %52, %54 : vector<16x256xf32>
    %56 = vector.extract_strided_slice %0 {offsets = [0, 15], sizes = [16, 1], strides = [1, 1]} : vector<16x28xf32> to vector<16x1xf32>
    %57 = vector.broadcast %56 : vector<16x1xf32> to vector<16x256xf32>
    %58 = arith.mulf %55, %57 : vector<16x256xf32>
    %c241_i32 = arith.constant 241 : i32
    %59 = tpu.dynamic_rotate %17 by %c241_i32 dim 1 : vector<16x256xf32>, i32 -> vector<16x256xf32>
    %c5 = arith.constant 5 : index
    %c0_13 = arith.constant 0 : index
    %60 = vector.load %arg9[%c5, %c0_13] : memref<16x256xf32, #tpu.memory_space<vmem>>, vector<1x256xf32>
    %61 = vector.broadcast %60 : vector<1x256xf32> to vector<16x256xf32>
    %62 = arith.mulf %59, %61 : vector<16x256xf32>
    %63 = vector.extract_strided_slice %0 {offsets = [0, 16], sizes = [16, 1], strides = [1, 1]} : vector<16x28xf32> to vector<16x1xf32>
    %64 = vector.broadcast %63 : vector<16x1xf32> to vector<16x256xf32>
    %65 = arith.mulf %62, %64 : vector<16x256xf32>
    %c240_i32 = arith.constant 240 : i32
    %66 = tpu.dynamic_rotate %17 by %c240_i32 dim 1 : vector<16x256xf32>, i32 -> vector<16x256xf32>
    %c6 = arith.constant 6 : index
    %c0_14 = arith.constant 0 : index
    %67 = vector.load %arg9[%c6, %c0_14] : memref<16x256xf32, #tpu.memory_space<vmem>>, vector<1x256xf32>
    %68 = vector.broadcast %67 : vector<1x256xf32> to vector<16x256xf32>
    %69 = arith.mulf %66, %68 : vector<16x256xf32>
    %70 = vector.extract_strided_slice %0 {offsets = [0, 17], sizes = [16, 1], strides = [1, 1]} : vector<16x28xf32> to vector<16x1xf32>
    %71 = vector.broadcast %70 : vector<16x1xf32> to vector<16x256xf32>
    %72 = arith.mulf %69, %71 : vector<16x256xf32>
    %c239_i32 = arith.constant 239 : i32
    %73 = tpu.dynamic_rotate %17 by %c239_i32 dim 1 : vector<16x256xf32>, i32 -> vector<16x256xf32>
    %c7 = arith.constant 7 : index
    %c0_15 = arith.constant 0 : index
    %74 = vector.load %arg9[%c7, %c0_15] : memref<16x256xf32, #tpu.memory_space<vmem>>, vector<1x256xf32>
    %75 = vector.broadcast %74 : vector<1x256xf32> to vector<16x256xf32>
    %76 = arith.mulf %73, %75 : vector<16x256xf32>
    %77 = vector.extract_strided_slice %0 {offsets = [0, 18], sizes = [16, 1], strides = [1, 1]} : vector<16x28xf32> to vector<16x1xf32>
    %78 = vector.broadcast %77 : vector<16x1xf32> to vector<16x256xf32>
    %79 = arith.mulf %76, %78 : vector<16x256xf32>
    %80 = arith.addf %23, %30 : vector<16x256xf32>
    %81 = arith.addf %37, %44 : vector<16x256xf32>
    %82 = arith.addf %51, %58 : vector<16x256xf32>
    %83 = arith.addf %65, %72 : vector<16x256xf32>
    %84 = arith.addf %80, %81 : vector<16x256xf32>
    %85 = arith.addf %82, %83 : vector<16x256xf32>
    %86 = arith.addf %84, %85 : vector<16x256xf32>
    %87 = arith.addf %86, %79 : vector<16x256xf32>
    %88 = vector.extract_strided_slice %0 {offsets = [0, 23], sizes = [16, 1], strides = [1, 1]} : vector<16x28xf32> to vector<16x1xf32>
    %89 = vector.broadcast %88 : vector<16x1xf32> to vector<16x256xf32>
    %90 = arith.mulf %17, %89 : vector<16x256xf32>
    %91 = vector.extract_strided_slice %0 {offsets = [0, 3], sizes = [16, 1], strides = [1, 1]} : vector<16x28xf32> to vector<16x1xf32>
    %92 = vector.broadcast %91 : vector<16x1xf32> to vector<16x256xf32>
    %93 = arith.addf %90, %92 : vector<16x256xf32>
    %c34_i32 = arith.constant 34 : i32
    %94 = tpu.dynamic_rotate %17 by %c34_i32 dim 1 : vector<16x256xf32>, i32 -> vector<16x256xf32>
    %c8 = arith.constant 8 : index
    %c0_16 = arith.constant 0 : index
    %95 = vector.load %arg9[%c8, %c0_16] : memref<16x256xf32, #tpu.memory_space<vmem>>, vector<1x256xf32>
    %96 = vector.broadcast %95 : vector<1x256xf32> to vector<16x256xf32>
    %97 = arith.mulf %94, %96 : vector<16x256xf32>
    %98 = vector.extract_strided_slice %0 {offsets = [0, 19], sizes = [16, 1], strides = [1, 1]} : vector<16x28xf32> to vector<16x1xf32>
    %99 = vector.broadcast %98 : vector<16x1xf32> to vector<16x256xf32>
    %100 = arith.mulf %97, %99 : vector<16x256xf32>
    %c32_i32 = arith.constant 32 : i32
    %101 = tpu.dynamic_rotate %17 by %c32_i32 dim 1 : vector<16x256xf32>, i32 -> vector<16x256xf32>
    %c9 = arith.constant 9 : index
    %c0_17 = arith.constant 0 : index
    %102 = vector.load %arg9[%c9, %c0_17] : memref<16x256xf32, #tpu.memory_space<vmem>>, vector<1x256xf32>
    %103 = vector.broadcast %102 : vector<1x256xf32> to vector<16x256xf32>
    %104 = arith.mulf %101, %103 : vector<16x256xf32>
    %105 = vector.extract_strided_slice %0 {offsets = [0, 20], sizes = [16, 1], strides = [1, 1]} : vector<16x28xf32> to vector<16x1xf32>
    %106 = vector.broadcast %105 : vector<16x1xf32> to vector<16x256xf32>
    %107 = arith.mulf %104, %106 : vector<16x256xf32>
    %c30_i32 = arith.constant 30 : i32
    %108 = tpu.dynamic_rotate %17 by %c30_i32 dim 1 : vector<16x256xf32>, i32 -> vector<16x256xf32>
    %c10 = arith.constant 10 : index
    %c0_18 = arith.constant 0 : index
    %109 = vector.load %arg9[%c10, %c0_18] : memref<16x256xf32, #tpu.memory_space<vmem>>, vector<1x256xf32>
    %110 = vector.broadcast %109 : vector<1x256xf32> to vector<16x256xf32>
    %111 = arith.mulf %108, %110 : vector<16x256xf32>
    %112 = vector.extract_strided_slice %0 {offsets = [0, 21], sizes = [16, 1], strides = [1, 1]} : vector<16x28xf32> to vector<16x1xf32>
    %113 = vector.broadcast %112 : vector<16x1xf32> to vector<16x256xf32>
    %114 = arith.mulf %111, %113 : vector<16x256xf32>
    %c2_i32 = arith.constant 2 : i32
    %115 = tpu.dynamic_rotate %17 by %c2_i32 dim 1 : vector<16x256xf32>, i32 -> vector<16x256xf32>
    %c11 = arith.constant 11 : index
    %c0_19 = arith.constant 0 : index
    %116 = vector.load %arg9[%c11, %c0_19] : memref<16x256xf32, #tpu.memory_space<vmem>>, vector<1x256xf32>
    %117 = vector.broadcast %116 : vector<1x256xf32> to vector<16x256xf32>
    %118 = arith.mulf %115, %117 : vector<16x256xf32>
    %119 = vector.extract_strided_slice %0 {offsets = [0, 22], sizes = [16, 1], strides = [1, 1]} : vector<16x28xf32> to vector<16x1xf32>
    %120 = vector.broadcast %119 : vector<16x1xf32> to vector<16x256xf32>
    %121 = arith.mulf %118, %120 : vector<16x256xf32>
    %c254_i32 = arith.constant 254 : i32
    %122 = tpu.dynamic_rotate %17 by %c254_i32 dim 1 : vector<16x256xf32>, i32 -> vector<16x256xf32>
    %c12 = arith.constant 12 : index
    %c0_20 = arith.constant 0 : index
    %123 = vector.load %arg9[%c12, %c0_20] : memref<16x256xf32, #tpu.memory_space<vmem>>, vector<1x256xf32>
    %124 = vector.broadcast %123 : vector<1x256xf32> to vector<16x256xf32>
    %125 = arith.mulf %122, %124 : vector<16x256xf32>
    %126 = vector.extract_strided_slice %0 {offsets = [0, 24], sizes = [16, 1], strides = [1, 1]} : vector<16x28xf32> to vector<16x1xf32>
    %127 = vector.broadcast %126 : vector<16x1xf32> to vector<16x256xf32>
    %128 = arith.mulf %125, %127 : vector<16x256xf32>
    %c226_i32 = arith.constant 226 : i32
    %129 = tpu.dynamic_rotate %17 by %c226_i32 dim 1 : vector<16x256xf32>, i32 -> vector<16x256xf32>
    %c13 = arith.constant 13 : index
    %c0_21 = arith.constant 0 : index
    %130 = vector.load %arg9[%c13, %c0_21] : memref<16x256xf32, #tpu.memory_space<vmem>>, vector<1x256xf32>
    %131 = vector.broadcast %130 : vector<1x256xf32> to vector<16x256xf32>
    %132 = arith.mulf %129, %131 : vector<16x256xf32>
    %133 = vector.extract_strided_slice %0 {offsets = [0, 25], sizes = [16, 1], strides = [1, 1]} : vector<16x28xf32> to vector<16x1xf32>
    %134 = vector.broadcast %133 : vector<16x1xf32> to vector<16x256xf32>
    %135 = arith.mulf %132, %134 : vector<16x256xf32>
    %c224_i32 = arith.constant 224 : i32
    %136 = tpu.dynamic_rotate %17 by %c224_i32 dim 1 : vector<16x256xf32>, i32 -> vector<16x256xf32>
    %c14 = arith.constant 14 : index
    %c0_22 = arith.constant 0 : index
    %137 = vector.load %arg9[%c14, %c0_22] : memref<16x256xf32, #tpu.memory_space<vmem>>, vector<1x256xf32>
    %138 = vector.broadcast %137 : vector<1x256xf32> to vector<16x256xf32>
    %139 = arith.mulf %136, %138 : vector<16x256xf32>
    %140 = vector.extract_strided_slice %0 {offsets = [0, 26], sizes = [16, 1], strides = [1, 1]} : vector<16x28xf32> to vector<16x1xf32>
    %141 = vector.broadcast %140 : vector<16x1xf32> to vector<16x256xf32>
    %142 = arith.mulf %139, %141 : vector<16x256xf32>
    %c222_i32 = arith.constant 222 : i32
    %143 = tpu.dynamic_rotate %17 by %c222_i32 dim 1 : vector<16x256xf32>, i32 -> vector<16x256xf32>
    %c15 = arith.constant 15 : index
    %c0_23 = arith.constant 0 : index
    %144 = vector.load %arg9[%c15, %c0_23] : memref<16x256xf32, #tpu.memory_space<vmem>>, vector<1x256xf32>
    %145 = vector.broadcast %144 : vector<1x256xf32> to vector<16x256xf32>
    %146 = arith.mulf %143, %145 : vector<16x256xf32>
    %147 = vector.extract_strided_slice %0 {offsets = [0, 27], sizes = [16, 1], strides = [1, 1]} : vector<16x28xf32> to vector<16x1xf32>
    %148 = vector.broadcast %147 : vector<16x1xf32> to vector<16x256xf32>
    %149 = arith.mulf %146, %148 : vector<16x256xf32>
    %150 = arith.addf %93, %100 : vector<16x256xf32>
    %151 = arith.addf %107, %114 : vector<16x256xf32>
    %152 = arith.addf %121, %128 : vector<16x256xf32>
    %153 = arith.addf %135, %142 : vector<16x256xf32>
    %154 = arith.addf %150, %151 : vector<16x256xf32>
    %155 = arith.addf %152, %153 : vector<16x256xf32>
    %156 = arith.addf %154, %155 : vector<16x256xf32>
    %157 = arith.addf %156, %149 : vector<16x256xf32>
    %158 = vector.extract_strided_slice %0 {offsets = [0, 4], sizes = [16, 1], strides = [1, 1]} : vector<16x28xf32> to vector<16x1xf32>
    %159 = vector.broadcast %158 : vector<16x1xf32> to vector<16x256xf32>
    %160 = arith.mulf %87, %159 : vector<16x256xf32>
    %161 = vector.extract_strided_slice %0 {offsets = [0, 5], sizes = [16, 1], strides = [1, 1]} : vector<16x28xf32> to vector<16x1xf32>
    %162 = vector.broadcast %161 : vector<16x1xf32> to vector<16x256xf32>
    %163 = arith.addf %160, %162 : vector<16x256xf32>
    %164 = arith.negf %163 : vector<16x256xf32>
    %165 = math.exp %164 : vector<16x256xf32>
    %cst_24 = arith.constant 1.000000e+00 : f32
    %166 = vector.broadcast %cst_24 : f32 to vector<16x256xf32>
    %167 = arith.addf %166, %165 : vector<16x256xf32>
    %168 = arith.divf %166, %167 : vector<16x256xf32>
    %169 = arith.mulf %163, %168 : vector<16x256xf32>
    %170 = vector.extract_strided_slice %0 {offsets = [0, 6], sizes = [16, 1], strides = [1, 1]} : vector<16x28xf32> to vector<16x1xf32>
    %171 = vector.broadcast %170 : vector<16x1xf32> to vector<16x256xf32>
    %172 = arith.mulf %157, %171 : vector<16x256xf32>
    %173 = vector.extract_strided_slice %0 {offsets = [0, 7], sizes = [16, 1], strides = [1, 1]} : vector<16x28xf32> to vector<16x1xf32>
    %174 = vector.broadcast %173 : vector<16x1xf32> to vector<16x256xf32>
    %175 = arith.addf %172, %174 : vector<16x256xf32>
    %176 = arith.negf %175 : vector<16x256xf32>
    %177 = math.exp %176 : vector<16x256xf32>
    %cst_25 = arith.constant 1.000000e+00 : f32
    %178 = vector.broadcast %cst_25 : f32 to vector<16x256xf32>
    %179 = arith.addf %178, %177 : vector<16x256xf32>
    %180 = arith.divf %178, %179 : vector<16x256xf32>
    %181 = arith.mulf %175, %180 : vector<16x256xf32>
    %cst_26 = arith.constant dense<0.000000e+00> : vector<16xf32>
    %182 = vector.multi_reduction <add>, %169, %cst_26 [1] : vector<16x256xf32> to vector<16xf32>
    %183 = vector.shape_cast %182 : vector<16xf32> to vector<16x1xf32>
    %cst_27 = arith.constant 2.560000e+02 : f32
    %184 = vector.broadcast %cst_27 : f32 to vector<16x1xf32>
    %185 = arith.divf %183, %184 : vector<16x1xf32>
    %cst_28 = arith.constant dense<0.000000e+00> : vector<16xf32>
    %186 = vector.multi_reduction <add>, %181, %cst_28 [1] : vector<16x256xf32> to vector<16xf32>
    %187 = vector.shape_cast %186 : vector<16xf32> to vector<16x1xf32>
    %cst_29 = arith.constant 2.560000e+02 : f32
    %188 = vector.broadcast %cst_29 : f32 to vector<16x1xf32>
    %189 = arith.divf %187, %188 : vector<16x1xf32>
    %c0_30 = arith.constant 0 : index
    %c0_31 = arith.constant 0 : index
    %190 = vector.load %arg4[%c0_30, %c0_31] : memref<2x16xf32, #tpu.memory_space<vmem>>, vector<2x16xf32>
    %cst_32 = arith.constant dense<0.000000e+00> : vector<2x1xf32>
    %191 = tpu.matmul %190, %185, %cst_32 {dimension_numbers = #tpu.dot_dimension_numbers<[1], [0], [0], [1], [0, 0, 1, 1], [], []>} : vector<2x16xf32>, vector<16x1xf32>, vector<2x1xf32> -> vector<2x1xf32>
    %c0_33 = arith.constant 0 : index
    %c0_34 = arith.constant 0 : index
    %192 = vector.load %arg5[%c0_33, %c0_34] : memref<2x16xf32, #tpu.memory_space<vmem>>, vector<2x16xf32>
    %cst_35 = arith.constant dense<0.000000e+00> : vector<2x1xf32>
    %193 = tpu.matmul %192, %189, %cst_35 {dimension_numbers = #tpu.dot_dimension_numbers<[1], [0], [0], [1], [0, 0, 1, 1], [], []>} : vector<2x16xf32>, vector<16x1xf32>, vector<2x1xf32> -> vector<2x1xf32>
    %194 = arith.addf %191, %193 : vector<2x1xf32>
    %c0_36 = arith.constant 0 : index
    %c0_37 = arith.constant 0 : index
    %195 = vector.load %arg8[%c0_36, %c0_37] : memref<2x1xf32, #tpu.memory_space<vmem>>, vector<2x1xf32>
    %196 = arith.addf %194, %195 : vector<2x1xf32>
    %cst_38 = arith.constant 0.000000e+00 : f32
    %197 = vector.broadcast %cst_38 : f32 to vector<2x1xf32>
    %198 = arith.maximumf %196, %197 : vector<2x1xf32>
    %c0_39 = arith.constant 0 : index
    %c0_40 = arith.constant 0 : index
    %199 = vector.load %arg6[%c0_39, %c0_40] : memref<16x2xf32, #tpu.memory_space<vmem>>, vector<16x2xf32>
    %cst_41 = arith.constant dense<0.000000e+00> : vector<16x1xf32>
    %200 = tpu.matmul %199, %198, %cst_41 {dimension_numbers = #tpu.dot_dimension_numbers<[1], [0], [0], [1], [0, 0, 1, 1], [], []>} : vector<16x2xf32>, vector<2x1xf32>, vector<16x1xf32> -> vector<16x1xf32>
    %201 = vector.extract_strided_slice %0 {offsets = [0, 8], sizes = [16, 1], strides = [1, 1]} : vector<16x28xf32> to vector<16x1xf32>
    %202 = arith.addf %200, %201 : vector<16x1xf32>
    %203 = arith.negf %202 : vector<16x1xf32>
    %204 = math.exp %203 : vector<16x1xf32>
    %cst_42 = arith.constant 1.000000e+00 : f32
    %205 = vector.broadcast %cst_42 : f32 to vector<16x1xf32>
    %206 = arith.addf %205, %204 : vector<16x1xf32>
    %207 = arith.divf %205, %206 : vector<16x1xf32>
    %c0_43 = arith.constant 0 : index
    %c0_44 = arith.constant 0 : index
    %208 = vector.load %arg7[%c0_43, %c0_44] : memref<16x2xf32, #tpu.memory_space<vmem>>, vector<16x2xf32>
    %cst_45 = arith.constant dense<0.000000e+00> : vector<16x1xf32>
    %209 = tpu.matmul %208, %198, %cst_45 {dimension_numbers = #tpu.dot_dimension_numbers<[1], [0], [0], [1], [0, 0, 1, 1], [], []>} : vector<16x2xf32>, vector<2x1xf32>, vector<16x1xf32> -> vector<16x1xf32>
    %210 = vector.extract_strided_slice %0 {offsets = [0, 9], sizes = [16, 1], strides = [1, 1]} : vector<16x28xf32> to vector<16x1xf32>
    %211 = arith.addf %209, %210 : vector<16x1xf32>
    %212 = arith.negf %211 : vector<16x1xf32>
    %213 = math.exp %212 : vector<16x1xf32>
    %cst_46 = arith.constant 1.000000e+00 : f32
    %214 = vector.broadcast %cst_46 : f32 to vector<16x1xf32>
    %215 = arith.addf %214, %213 : vector<16x1xf32>
    %216 = arith.divf %214, %215 : vector<16x1xf32>
    %217 = vector.broadcast %207 : vector<16x1xf32> to vector<16x256xf32>
    %218 = arith.mulf %169, %217 : vector<16x256xf32>
    %219 = vector.broadcast %216 : vector<16x1xf32> to vector<16x256xf32>
    %220 = arith.mulf %181, %219 : vector<16x256xf32>
    %c0_47 = arith.constant 0 : index
    %c0_48 = arith.constant 0 : index
    %c0_49 = arith.constant 0 : index
    %221 = vector.load %arg1[%c0_47, %c0_48, %c0_49] : memref<1x32x256xf32, #tpu.memory_space<vmem>>, vector<1x16x256xf32>
    %222 = vector.shape_cast %221 : vector<1x16x256xf32> to vector<16x256xf32>
    %223 = arith.addf %218, %222 : vector<16x256xf32>
    %c0_50 = arith.constant 0 : index
    %c16 = arith.constant 16 : index
    %c0_51 = arith.constant 0 : index
    %224 = vector.load %arg1[%c0_50, %c16, %c0_51] : memref<1x32x256xf32, #tpu.memory_space<vmem>>, vector<1x16x256xf32>
    %225 = vector.shape_cast %224 : vector<1x16x256xf32> to vector<16x256xf32>
    %226 = arith.addf %220, %225 : vector<16x256xf32>
    %c0_52 = arith.constant 0 : index
    %c0_53 = arith.constant 0 : index
    %c0_54 = arith.constant 0 : index
    %227 = vector.load %arg12[%c0_52, %c0_53, %c0_54] : memref<1x32x256xf32, #tpu.memory_space<vmem>>, vector<1x16x256xf32>
    %228 = vector.shape_cast %227 : vector<1x16x256xf32> to vector<16x256xf32>
    %229 = vector.shape_cast %223 : vector<16x256xf32> to vector<1x16x256xf32>
    tpu.vector_store %arg12[%c0_52, %c0_53, %c0_54], %229 {strides = array<i32>} : memref<1x32x256xf32, #tpu.memory_space<vmem>>, vector<1x16x256xf32>,
    %c0_55 = arith.constant 0 : index
    %c16_56 = arith.constant 16 : index
    %c0_57 = arith.constant 0 : index
    %230 = vector.load %arg12[%c0_55, %c16_56, %c0_57] : memref<1x32x256xf32, #tpu.memory_space<vmem>>, vector<1x16x256xf32>
    %231 = vector.shape_cast %230 : vector<1x16x256xf32> to vector<16x256xf32>
    %232 = vector.shape_cast %226 : vector<16x256xf32> to vector<1x16x256xf32>
    tpu.vector_store %arg12[%c0_55, %c16_56, %c0_57], %232 {strides = array<i32>} : memref<1x32x256xf32, #tpu.memory_space<vmem>>, vector<1x16x256xf32>,
    return
  }
  func.func @transform_0(%arg0: i32) -> (i32, i32, i32) {
    %c0_i32 = arith.constant 0 : i32
    %c0_i32_0 = arith.constant 0 : i32
    %c0_i32_1 = arith.constant 0 : i32
    return %arg0, %c0_i32, %c0_i32_0 : i32, i32, i32
  }
  func.func @transform_1(%arg0: i32) -> (i32, i32) {
    %c0_i32 = arith.constant 0 : i32
    %c0_i32_0 = arith.constant 0 : i32
    %c0_i32_1 = arith.constant 0 : i32
    return %c0_i32, %c0_i32_0 : i32, i32
  }
  func.func @transform_2(%arg0: i32) -> (i32, i32) {
    %c0_i32 = arith.constant 0 : i32
    %c0_i32_0 = arith.constant 0 : i32
    %c0_i32_1 = arith.constant 0 : i32
    return %c0_i32, %c0_i32_0 : i32, i32
  }
  func.func @transform_3(%arg0: i32) -> (i32, i32) {
    %c0_i32 = arith.constant 0 : i32
    %c0_i32_0 = arith.constant 0 : i32
    %c0_i32_1 = arith.constant 0 : i32
    return %c0_i32, %c0_i32_0 : i32, i32
  }
  func.func @transform_4(%arg0: i32) -> (i32, i32) {
    %c0_i32 = arith.constant 0 : i32
    %c0_i32_0 = arith.constant 0 : i32
    %c0_i32_1 = arith.constant 0 : i32
    return %c0_i32, %c0_i32_0 : i32, i32
  }
  func.func @transform_5(%arg0: i32) -> (i32, i32) {
    %c0_i32 = arith.constant 0 : i32
    %c0_i32_0 = arith.constant 0 : i32
    %c0_i32_1 = arith.constant 0 : i32
    return %c0_i32, %c0_i32_0 : i32, i32
  }
  func.func @transform_6(%arg0: i32) -> (i32, i32) {
    %c0_i32 = arith.constant 0 : i32
    %c0_i32_0 = arith.constant 0 : i32
    %c0_i32_1 = arith.constant 0 : i32
    return %c0_i32, %c0_i32_0 : i32, i32
  }
  func.func @transform_7(%arg0: i32) -> (i32, i32) {
    %c0_i32 = arith.constant 0 : i32
    %c0_i32_0 = arith.constant 0 : i32
    %c0_i32_1 = arith.constant 0 : i32
    return %c0_i32, %c0_i32_0 : i32, i32
  }
  func.func @transform_8(%arg0: i32) -> (i32, i32) {
    %c0_i32 = arith.constant 0 : i32
    %c0_i32_0 = arith.constant 0 : i32
    %c0_i32_1 = arith.constant 0 : i32
    return %c0_i32, %c0_i32_0 : i32, i32
  }
  func.func @transform_9(%arg0: i32) -> (i32, i32) {
    %c0_i32 = arith.constant 0 : i32
    %c0_i32_0 = arith.constant 0 : i32
    %c0_i32_1 = arith.constant 0 : i32
    return %c0_i32, %c0_i32_0 : i32, i32
  }
  func.func @transform_10(%arg0: i32) -> (i32, i32) {
    %c0_i32 = arith.constant 0 : i32
    %c0_i32_0 = arith.constant 0 : i32
    %c0_i32_1 = arith.constant 0 : i32
    return %c0_i32, %c0_i32_0 : i32, i32
  }
  func.func @transform_11(%arg0: i32) -> (i32, i32, i32) {
    %c0_i32 = arith.constant 0 : i32
    %c0_i32_0 = arith.constant 0 : i32
    %c0_i32_1 = arith.constant 0 : i32
    return %arg0, %c0_i32, %c0_i32_0 : i32, i32, i32
  }
}

</mosaic_0001>

<bundles_post_ra>
// kernel: context_guided_block.1
= control target key start
LH: loop header
LB: loop body
LE: loop exit
PB: predicated region body
PF: predicated region fallthrough
CT: control target
= control target key end

     0   :  { %s2124_s17 = smov 0   ;;  %s3155_s0 = inlined_call_operand.vmem [shape: f32[2,32,256], index: 0, kind: input, shape index: {}]   ;;  %s3156_s1 = inlined_call_operand.vmem [shape: bf16[16,32], index: 1, kind: input, shape index: {}]   ;;  %s3157_s2 = inlined_call_operand.vmem [shape: f32[16,28], index: 2, kind: input, shape index: {}]   ;;  %s3158_s3 = inlined_call_operand.vmem [shape: f32[2,16], index: 3, kind: input, shape index: {}]   ;;  %s3159_s4 = inlined_call_operand.vmem [shape: f32[2,16], index: 4, kind: input, shape index: {}]   ;;  %s3160_s5 = inlined_call_operand.vmem [shape: f32[16,2], index: 5, kind: input, shape index: {}]   ;;  %s3161_s6 = inlined_call_operand.vmem [shape: f32[16,2], index: 6, kind: input, shape index: {}]   ;;  %s3162_s7 = inlined_call_operand.vmem [shape: f32[2,1], index: 7, kind: input, shape index: {}]   ;;  %s3163_s8 = inlined_call_operand.vmem [shape: f32[16,256], index: 8, kind: input, shape index: {}]   ;;  %s3164_s9 = inlined_call_operand.vmem [shape: f32[256,1], index: 9, kind: input, shape index: {}]   ;;  %s3165_s10 = inlined_call_operand.vmem [shape: f32[1,256], index: 10, kind: input, shape index: {}]   ;;  %s3166_s11 = inlined_call_operand.vmem [shape: f32[2,32,256], index: 11, kind: output, shape index: {}]  }
   0x1 LB: > { %s1777_s18 = sadd.s32 4294967295, %s2017_s17   ;;  %p1781_p0 = scmp.ge.s32.totalorder %s2017_s17, 1  ;;  %s2017_s17 = sphi %s2124_s17, %s21_s17  }
   0x2   : > { %p337_p1 = scmp.lt.s32.totalorder %s2017_s17, 3 }
   0x4   : > { %p338_p2 = pnand %p1781_p0, %p337_p1 }
   0x6   : > { %341 = sbr.rel (%p338_p2) target bundleno = 1181 (0x49d), region = 64 }
   0xb   : > { %p377_p3 = scmp.lt.s32.totalorder %s1777_s18, 1  ;;  %v2135_v0 = vld [vmem:[%s3157_s2 + $0x8] sm:$0xff]  ;;  %v2019_v1 = vmov 1   ;;  %v3167_v2 = vmov 0   ;;  %v2141_v3 = vld [vmem:[%s3157_s2] sm:$0xff]  ;;  %v2021_v7 = vmov 14  }
   0xc   : > { %1890 = vset.pattern.permute.xlu1 %v2019_v1  ;;  %1889 = vset.pattern.permute.xlu0 %v3167_v2  ;;  %v1835_v17 = vld [vmem:[%s3156_s1] sm:$0xff]  ;;  %vm409_vm0 = vcmask 261120   ;;  %v2022_v18 = vmov 2   ;;  %v2023_v19 = vmov 10   ;;  %v2024_v20 = vmov 23   ;;  %s2028_s27 = smov 1  }
   0xd   : > { %s3281_s18 = smov (!%p377_p3, %s1777_s18), 1  ;;  %460 = vperm.xlu1 %1890, %v2135_v0   ;;  %443 = vperm.xlu0 %1889, %v2141_v3   ;;  %v2025_v21 = vmov 11   ;;  %v2026_v24 = vmov 15   ;;  %v2027_v25 = vmov 13   ;;  %s2029_s28 = smov 16  }
   0xe   : > { %s1833_s21 = sshll.u32 %s3281_s18, 6  ;;  %1891 = vset.pattern.permute.xlu2 %v2021_v7  ;;  %s2030_s29 = smov 17  }
   0xf   : > { %s2153_s24 = scalar_lea.vmem %s3155_s0, %s1833_s21  ;;  %548 = vperm.xlu2 %1891, %v2141_v3   ;;  %s2031_s30 = smov 127  }
  0x10   : > { %v396_v4 = vld [vmem:[%s2153_s24 + $0x20] sm:$0xff]  ;;  %v398_v5 = vld [vmem:[%s2153_s24 + $0x30] sm:$0xff]  ;;  %v397_v6 = vld [vmem:[%s2153_s24 + $0x28] sm:$0xff]  ;;  %s2032_s12 = smov 15   ;;  %s2033_s13 = smov 112  }
  0x11   : > { %v402_v8 = vpack.c.bf16 %v398_v5, %v396_v4  ;;  %v399_v9 = vld [vmem:[%s2153_s24 + $0x38] sm:$0xff]  ;;  %v392_v10 = vld [vmem:[%s2153_s24] sm:$0xff]  ;;  %v394_v11 = vld [vmem:[%s2153_s24 + $0x10] sm:$0xff]  ;;  %s2034_s14 = smov 34   ;;  %s2035_s15 = smov 113  }
  0x12   : > { %v403_v12 = vpack.c.bf16 %v399_v9, %v397_v6  ;;  %v393_v13 = vld [vmem:[%s2153_s24 + $0x8] sm:$0xff]  ;;  %v395_v14 = vld [vmem:[%s2153_s24 + $0x18] sm:$0xff]  ;;  %v400_v15 = vpack.c.bf16 %v394_v11, %v392_v10  ;;  %s2036_s16 = smov 30   ;;  %s2037_s9 = smov 2  }
  0x13   : > { %419 = vmatpush.bf16.msra.mxu0 %v402_v8  ;;  %v401_v16 = vpack.c.bf16 %v395_v14, %v393_v13  ;;  %s2038_s10 = smov 32   ;;  %s2039_s19 = smov 98  }
  0x14   : > { %433 = vmatpush.bf16.msra.mxu1 %v403_v12  ;;  %s2040_s20 = smov 96   ;;  %s2041_s22 = smov 126  }
  0x15   : > { %456 = vperm.xlu1 %1890, %v2141_v3   ;;  %448 = vperm.xlu0 %1889, %v2135_v0   ;;  %s2053_s26 = smov 94  }
  0x17   : > { %420 = vmatpush.bf16.msra.mxu0 %v400_v15  ;;  %552 = vperm.xlu2 %1891, %v2135_v0  }
  0x18   : > { %434 = vmatpush.bf16.msra.mxu1 %v401_v16 }
  0x1a   : > { %1790 = vmatmul.msk.bf16.vlgmr.msra.gmra.mxu0 %vm409_vm0, %v1835_v17 }
  0x1b   : > { %1791 = vmatmul.msk.bf16.vlgmr.msra.gmra.mxu1 %vm409_vm0, %v1835_v17 }
  0x1d   : > { %1893 = vset.pattern.permute.xlu1 %v2022_v18  ;;  %1892 = vset.pattern.permute.xlu0 %v2022_v18 }
  0x1e   : > { %564 = vperm.xlu1 %1893, %v2135_v0   ;;  %560 = vperm.xlu0 %1892, %v2141_v3  }
  0x1f   : > { %1895 = vset.pattern.permute.xlu2 %v2023_v19 }
  0x20   : > { %601 = vperm.xlu2 %1895, %v2135_v0  }
  0x26   : > { %1894 = vset.pattern.permute.xlu1 %v2023_v19  ;;  %1902 = vset.pattern.permute.xlu0 %v2024_v20 }
  0x27   : > { %597 = vperm.xlu1 %1894, %v2141_v3  }
  0x28   : > { %1897 = vset.pattern.permute.xlu2 %v2025_v21 }
  0x29   : > { %637 = vperm.xlu2 %1897, %v2135_v0  }
  0x2f   : > { %1896 = vset.pattern.permute.xlu1 %v2024_v20 }
  0x30   : > { %897 = vperm.xlu1 %1896, %v2135_v0  }
  0x31   : > { %1899 = vset.pattern.permute.xlu2 %v2026_v24 }
  0x32   : > { %745 = vperm.xlu2 %1899, %v2135_v0  }
  0x38   : > { %1898 = vset.pattern.permute.xlu1 %v2027_v25 }
  0x39   : > { %709 = vperm.xlu1 %1898, %v2135_v0  }
  0x69   : > { %v2193_v4 = vpop.permute.xlu2 %548 }
  0x7f   : > { %v461_v22 = vpop.permute.xlu1 %460  ;;  %v444_v23 = vpop.permute.xlu0 %443 }
  0x87   : > { %v457_v29 = vpop.permute.xlu1 %456  ;;  %v449_v35 = vpop.permute.xlu0 %448 }
  0x97   : > { %v422_v26 = vpop.f32.mrf.mxu0 }
  0x98   : > { %v451_v27 = vmul.f32 %v444_v23, %v422_v26  ;;  %v436_v28 = vpop.f32.mrf.mxu1 }
  0x99   : > { %v452_v30 = vmul.f32 %v444_v23, %v436_v28 }
  0x9a   : > { %v463_v31 = vadd.f32 %v457_v29, %v451_v27 }
  0x9b   : > { %v2181_v32 = vadd.f32 %v457_v29, %v452_v30 }
  0x9c   : > { %v1792_v33 = vmul.f32 -1.442695, %v463_v31 }
  0x9d   : > { %v1793_v34 = vmul.f32 -1.442695, %v2181_v32 }
  0x9e   : > { %1939 = vpow2.f32 %v1792_v33 }
  0x9f   : > { %1941 = vpow2.f32 %v1793_v34  ;;  %v424_v36 = vpop.f32.mrf.mxu0 }
  0xa0   : > { %v453_v37 = vmul.f32 %v449_v35, %v424_v36  ;;  %v438_v38 = vpop.f32.mrf.mxu1 }
  0xa1   : > { %v454_v39 = vmul.f32 %v449_v35, %v438_v38  ;;  %v553_v35 = vpop.permute.xlu2 %552 }
  0xa2   : > { %v2184_v40 = vadd.f32 %v461_v22, %v453_v37 }
  0xa3   : > { %v2186_v41 = vadd.f32 %v461_v22, %v454_v39 }
  0xa4   : > { %v1940_v42 = vpop.eup %1939  ;;  %v1794_v43 = vmul.f32 -1.442695, %v2184_v40 }
  0xa5   : > { %v1942_v44 = vpop.eup %1941  ;;  %v479_v45 = vadd.f32 1.0, %v1940_v42  ;;  %v1795_v46 = vmul.f32 -1.442695, %v2186_v41 }
  0xa6   : > { %v480_v47 = vadd.f32 1.0, %v1942_v44  ;;  %1943 = vpow2.f32 %v1794_v43 }
  0xa7   : > { %1945 = vrcp.f32 %v479_v45  ;;  %v492_v57 = vand.u32 2147483647, %v479_v45  ;;  %v494_v58 = vand.u32 2147483648, %v479_v45  ;;  %vm488_vm2 = vweird.f32 %v479_v45 }
  0xa8   : > { %1947 = vrcp.f32 %v480_v47  ;;  %v507_v9 = vand.u32 2147483647, %v480_v47  ;;  %v509_v10 = vand.u32 2147483648, %v480_v47  ;;  %vm503_vm6 = vweird.f32 %v480_v47 }
  0xa9   : > { %1949 = vpow2.f32 %v1795_v46  ;;  %vm493_vm4 = vcmp.eq.f32.partialorder %v492_v57, 8.507059e+37  ;;  %v495_v1 = vor.u32 1.1754944e-38, %v494_v58 }
  0xaa   : > { %vm508_vm9 = vcmp.eq.f32.partialorder %v507_v9, 8.507059e+37  ;;  %v510_v20 = vor.u32 1.1754944e-38, %v509_v10 }
  0xac   : > { %v1944_v48 = vpop.eup %1943 }
  0xad   : > { %v1946_v49 = vpop.eup %1945  ;;  %v481_v50 = vadd.f32 1.0, %v1944_v48 }
  0xae   : > { %v1948_v51 = vpop.eup %1947  ;;  %v484_v52 = vmul.f32 %v1946_v49, %v479_v45  ;;  %vm489_vm1 = vweird.f32 %v1946_v49 }
  0xaf   : > { %v1950_v53 = vpop.eup %1949  ;;  %v499_v54 = vmul.f32 %v1948_v51, %v480_v47  ;;  %1951 = vrcp.f32 %v481_v50  ;;  %vm490_vm3 = vmor %vm488_vm2, %vm489_vm1  ;;  %vm504_vm5 = vweird.f32 %v1948_v51  ;;  %v524_v14 = vand.u32 2147483648, %v481_v50 }
  0xb0   : > { %v485_v55 = vsub.f32 1.0, %v484_v52  ;;  %v2190_v56 = vadd.f32 1.0, %v1950_v53  ;;  %vm2197_vm7 = vmor %vm503_vm6, %vm504_vm5  ;;  %v522_v19 = vand.u32 2147483647, %v481_v50  ;;  %vm518_vm10 = vweird.f32 %v481_v50 }
  0xb1   : > { %v500_v59 = vsub.f32 1.0, %v499_v54  ;;  %v525_v26 = vor.u32 1.1754944e-38, %v524_v14  ;;  %v2306_v53 = vld [vmem:[%s3163_s8] ss:$8 sm:$0x3] }
  0xb2   : > { %v486_v60 = vmul.f32 %v1946_v49, %v485_v55  ;;  %1953 = vrcp.f32 %v2190_v56  ;;  %v539_v27 = vand.u32 2147483648, %v2190_v56  ;;  %v537_v30 = vand.u32 2147483647, %v2190_v56 }
  0xb3   : > { %v501_v61 = vmul.f32 %v1948_v51, %v500_v59  ;;  %vm523_vm13 = vcmp.eq.f32.partialorder %v522_v19, 8.507059e+37  ;;  %vm533_vm14 = vweird.f32 %v2190_v56  ;;  %v588_v55 = vperm.slane %v2306_v53, 0 }
  0xb4   : > { %v487_v62 = vadd.f32 %v1946_v49, %v486_v60  ;;  %v540_v38 = vor.u32 1.1754944e-38, %v539_v27  ;;  %vm538_vm0 = vcmp.eq.f32.partialorder %v537_v30, 8.507059e+37  ;;  %v561_v60 = vpop.permute.xlu0 %560  ;;  %v2043_v19 = vmov 17  }
  0xb5   : > { %v1952_v63 = vpop.eup %1951  ;;  %v502_v6 = vadd.f32 %v1948_v51, %v501_v61  ;;  %1901 = vset.pattern.permute.xlu2 %v2043_v19 }
  0xb6   : > { %v491_v5 = vsel %vm490_vm3, %v1946_v49, %v487_v62  ;;  %v514_v7 = vmul.f32 %v1952_v63, %v481_v50  ;;  %vm519_vm8 = vweird.f32 %v1952_v63  ;;  %v579_v50 = vlaneseq }
  0xb7   : > { %v496_v8 = vsel %vm493_vm4, %v495_v1, %v491_v5  ;;  %v506_v17 = vsel %vm2197_vm7, %v1948_v51, %v502_v6  ;;  %vm520_vm11 = vmor %vm518_vm10, %vm519_vm8 }
  0xb8   : > { %v1954_v11 = vpop.eup %1953  ;;  %v2195_v12 = vmul.f32 %v496_v8, %v463_v31  ;;  %v515_v13 = vsub.f32 1.0, %v514_v7  ;;  %v511_v28 = vsel %vm508_vm9, %v510_v20, %v506_v17  ;;  %v2301_v52 = vand.u32 127, %v579_v50 }
  0xb9   : > { %v529_v16 = vmul.f32 %v1954_v11, %v2190_v56  ;;  %vm534_vm12 = vweird.f32 %v1954_v11  ;;  %v2215_v36 = vmul.f32 %v511_v28, %v2181_v32  ;;  %v589_v56 = vperm.slane %v2306_v53, 1 }
  0xba   : > { %3204 = vst [vmem:[#allocation2_spill] sm:$0xff] %v2195_v12  ;;  %v516_v18 = vmul.f32 %v1952_v63, %v515_v13  ;;  %680 = vrot.lane.b32.xlu1 %v2195_v12, %s2028_s27  ;;  %608 = vrot.lane.b32.xlu0 %v2195_v12, %s2029_s28  ;;  %vm535_vm15 = vmor %vm533_vm14, %vm534_vm12  ;;  %vm581_vm1 = vcmp.lt.s32.totalorder %v2301_v52, 17  ;;  %v555_v57 = vmul.f32 %v2193_v4, %v2195_v12  ;;  %v2042_v13 = vmov 16  }
  0xbb   : > { %v530_v22 = vsub.f32 1.0, %v529_v16  ;;  %571 = vrot.lane.b32.xlu2 %v2195_v12, %s2030_s29  ;;  %3207 = vst [vmem:[#allocation3_spill] sm:$0xff] %v2215_v36  ;;  %v556_v58 = vmul.f32 %v2193_v4, %v2215_v36  ;;  %1900 = vset.pattern.permute.xlu1 %v2042_v13  ;;  %vm616_vm2 = vcmp.lt.s32.totalorder %v2301_v52, 16  ;;  %vm652_vm3 = vcmp.lt.s32.totalorder %v2301_v52, 15 }
  0xbc   : > { %v517_v23 = vadd.f32 %v1952_v63, %v516_v18  ;;  %3208 = vst [vmem:[#allocation4_spill] sm:$0xff] %v2301_v52  ;;  %v567_v5 = vadd.f32 %v561_v60, %v555_v57  ;;  %vm688_vm4 = vcmp.lt.s32.totalorder %v2301_v52, 1  ;;  %vm724_vm5 = vcmp.lt.s32.totalorder %v2301_v52, 127 }
  0xbd   : > { %v531_v29 = vmul.f32 %v1954_v11, %v530_v22  ;;  %v568_v6 = vadd.f32 %v561_v60, %v556_v58  ;;  %vm760_vm6 = vcmp.lt.s32.totalorder %v2301_v52, 113  ;;  %vm796_vm7 = vcmp.lt.s32.totalorder %v2301_v52, 112 }
  0xbe   : > { %v521_v31 = vsel %vm520_vm11, %v1952_v63, %v517_v23  ;;  %vm924_vm8 = vcmp.lt.s32.totalorder %v2301_v52, 34  ;;  %v2044_v60 = vmov 3   ;;  %vm960_vm9 = vcmp.lt.s32.totalorder %v2301_v52, 32 }
  0xbf   : > { %v526_v33 = vsel %vm523_vm13, %v525_v26, %v521_v31  ;;  %v532_v34 = vadd.f32 %v1954_v11, %v531_v29  ;;  %vm996_vm10 = vcmp.lt.s32.totalorder %v2301_v52, 30  ;;  %vm1032_vm11 = vcmp.lt.s32.totalorder %v2301_v52, 2 }
  0xc0   : > { %v2218_v37 = vmul.f32 %v526_v33, %v2184_v40  ;;  %v565_v40 = vpop.permute.xlu1 %564  ;;  %vm1068_vm12 = vcmp.lt.s32.totalorder %v2301_v52, 126  ;;  %vm1104_vm13 = vcmp.lt.s32.totalorder %v2301_v52, 98  ;;  %vm1140_vm14 = vcmp.lt.s32.totalorder %v2301_v52, 96 }
  0xc1   : > { %v536_v39 = vsel %vm535_vm15, %v1954_v11, %v532_v34 }
  0xc2   : > { %v541_v42 = vsel %vm538_vm0, %v540_v38, %v536_v39  ;;  %v557_v43 = vmul.f32 %v553_v35, %v2218_v37  ;;  %720 = vrot.lane.b32.xlu1 %v2215_v36, %s2031_s30  ;;  %648 = vrot.lane.b32.xlu0 %v2215_v36, %s2032_s12 }
  0xc3   : > { %v2226_v32 = vmul.f32 %v541_v42, %v2186_v41  ;;  %575 = vrot.lane.b32.xlu2 %v2215_v36, %s2030_s29  ;;  %v2271_v41 = vpop.permute.xlu2 %601 }
  0xc4   : > { %v2230_v44 = vadd.f32 %v565_v40, %v557_v43 }
  0xc5   : > { %v558_v45 = vmul.f32 %v553_v35, %v2226_v32 }
  0xc7   : > { %v2233_v46 = vadd.f32 %v565_v40, %v558_v45 }
  0xc8   : > { %v598_v49 = vpop.permute.xlu1 %597 }
  0xca   : > { %788 = vrot.lane.b32.xlu1 %v2195_v12, %s2033_s13  ;;  %716 = vrot.lane.b32.xlu0 %v2195_v12, %s2031_s30 }
  0xcb   : > { %612 = vrot.lane.b32.xlu2 %v2215_v36, %s2029_s28  ;;  %v2279_v47 = vpop.permute.xlu2 %637 }
  0xd0   : > { %v2308_v54 = vpop.permute.xlu1 %897 }
  0xd2   : > { %920 = vrot.lane.b32.xlu1 %v2215_v36, %s2034_s14  ;;  %756 = vrot.lane.b32.xlu0 %v2215_v36, %s2035_s15 }
  0xd3   : > { %644 = vrot.lane.b32.xlu2 %v2195_v12, %s2032_s12  ;;  %v2293_v48 = vpop.permute.xlu2 %745 }
  0xd8   : > { %v2335_v4 = vpop.permute.xlu1 %709 }
  0xda   : > { %988 = vrot.lane.b32.xlu1 %v2195_v12, %s2036_s16  ;;  %916 = vrot.lane.b32.xlu0 %v2195_v12, %s2034_s14 }
  0xdb   : > { %684 = vrot.lane.b32.xlu2 %v2215_v36, %s2028_s27 }
  0xe2   : > { %1028 = vrot.lane.b32.xlu1 %v2215_v36, %s2037_s9  ;;  %956 = vrot.lane.b32.xlu0 %v2215_v36, %s2038_s10 }
  0xe3   : > { %752 = vrot.lane.b32.xlu2 %v2195_v12, %s2035_s15 }
  0xea   : > { %1096 = vrot.lane.b32.xlu1 %v2195_v12, %s2039_s19  ;;  %1024 = vrot.lane.b32.xlu0 %v2195_v12, %s2037_s9 }
  0xeb   : > { %792 = vrot.lane.b32.xlu2 %v2215_v36, %s2033_s13 }
  0xf2   : > { %1136 = vrot.lane.b32.xlu1 %v2215_v36, %s2040_s20  ;;  %1064 = vrot.lane.b32.xlu0 %v2215_v36, %s2041_s22 }
  0xf3   : > { %952 = vrot.lane.b32.xlu2 %v2195_v12, %s2038_s10 }
  0xfa   : > { %1132 = vrot.lane.b32.xlu0 %v2195_v12, %s2040_s20  ;;  %573 = vrot.lane.b32.xlu1 %v2218_v37, %s2030_s29 }
  0xfb   : > { %992 = vrot.lane.b32.xlu2 %v2215_v36, %s2036_s16 }
 0x102   : > { %577 = vrot.lane.b32.xlu0 %v2226_v32, %s2030_s29  ;;  %610 = vrot.lane.b32.xlu1 %v2218_v37, %s2029_s28  ;;  %s3128_s29 = scalar_lea.vmem %s3166_s11, %s1833_s21 }
 0x103   : > { %1060 = vrot.lane.b32.xlu2 %v2195_v12, %s2041_s22 }
 0x10a   : > { %614 = vrot.lane.b32.xlu0 %v2226_v32, %s2029_s28  ;;  %646 = vrot.lane.b32.xlu1 %v2218_v37, %s2032_s12 }
 0x10b   : > { %1100 = vrot.lane.b32.xlu2 %v2215_v36, %s2039_s19 }
 0x112   : > { %682 = vrot.lane.b32.xlu0 %v2218_v37, %s2028_s27  ;;  %686 = vrot.lane.b32.xlu1 %v2226_v32, %s2028_s27 }
 0x113   : > { %650 = vrot.lane.b32.xlu2 %v2226_v32, %s2032_s12  ;;  %s2055_s12 = smov 111  }
 0x115   : > { %v572_v51 = vpop.permute.xlu2 %571 }
 0x11a   : > { %722 = vrot.lane.b32.xlu0 %v2226_v32, %s2031_s30  ;;  %754 = vrot.lane.b32.xlu1 %v2218_v37, %s2035_s15 }
 0x11b   : > { %718 = vrot.lane.b32.xlu2 %v2218_v37, %s2031_s30 }
 0x11d   : > { %v576_v59 = vpop.permute.xlu2 %575 }
 0x11e   : > { %v582_v61 = vsel %vm581_vm1, %v572_v51, %v576_v59  ;;  %v584_v62 = vsel %vm581_vm1, %v576_v59, %v572_v51 }
 0x11f   : > { %v592_v63 = vmul.f32 %v588_v55, %v584_v62  ;;  %v593_v1 = vmul.f32 %v589_v56, %v582_v61 }
 0x121   : > { %v604_v7 = vmul.f32 %v598_v49, %v592_v63  ;;  %v605_v8 = vmul.f32 %v598_v49, %v593_v1 }
 0x122   : > { %790 = vrot.lane.b32.xlu0 %v2218_v37, %s2033_s13  ;;  %794 = vrot.lane.b32.xlu1 %v2226_v32, %s2033_s13  ;;  %s2062_s13 = smov 119  }
 0x123   : > { %v2337_v9 = vadd.f32 %v604_v7, %v567_v5  ;;  %v2339_v10 = vadd.f32 %v605_v8, %v568_v6  ;;  %758 = vrot.lane.b32.xlu2 %v2226_v32, %s2035_s15  ;;  %v3169_v8 = vmov 22  }
 0x125   : > { %v613_v11 = vpop.permute.xlu2 %612 }
 0x12a   : > { %922 = vrot.lane.b32.xlu0 %v2226_v32, %s2034_s14  ;;  %954 = vrot.lane.b32.xlu1 %v2218_v37, %s2038_s10 }
 0x12b   : > { %918 = vrot.lane.b32.xlu2 %v2218_v37, %s2034_s14  ;;  %s2063_s14 = smov 120  }
 0x12c   : > { %v681_v14 = vpop.permute.xlu1 %680  ;;  %v609_v15 = vpop.permute.xlu0 %608 }
 0x12d   : > { %v2353_v16 = vsel %vm616_vm2, %v609_v15, %v613_v11  ;;  %v2357_v17 = vsel %vm616_vm2, %v613_v11, %v609_v15  ;;  %v645_v18 = vpop.permute.xlu2 %644  ;;  %v2046_v11 = vmov 19  }
 0x132   : > { %990 = vrot.lane.b32.xlu0 %v2218_v37, %s2036_s16  ;;  %994 = vrot.lane.b32.xlu1 %v2226_v32, %s2036_s16 }
 0x133   : > { %958 = vrot.lane.b32.xlu2 %v2226_v32, %s2038_s10 }
 0x134   : > { %v721_v20 = vpop.permute.xlu1 %720  ;;  %v649_v22 = vpop.permute.xlu0 %648 }
 0x135   : > { %v2370_v23 = vsel %vm652_vm3, %v645_v18, %v649_v22  ;;  %v2374_v26 = vsel %vm652_vm3, %v649_v22, %v645_v18  ;;  %v685_v27 = vpop.permute.xlu2 %684 }
 0x136   : > { %v2378_v28 = vsel %vm688_vm4, %v681_v14, %v685_v27  ;;  %v2382_v29 = vsel %vm688_vm4, %v685_v27, %v681_v14  ;;  %v3174_v14 = vmov 20  }
 0x13a   : > { %1030 = vrot.lane.b32.xlu0 %v2226_v32, %s2037_s9  ;;  %1062 = vrot.lane.b32.xlu1 %v2218_v37, %s2041_s22 }
 0x13b   : > { %1026 = vrot.lane.b32.xlu2 %v2218_v37, %s2037_s9 }
 0x13c   : > { %v789_v30 = vpop.permute.xlu1 %788  ;;  %v717_v31 = vpop.permute.xlu0 %716 }
 0x13d   : > { %v2393_v33 = vsel %vm724_vm5, %v717_v31, %v721_v20  ;;  %v2397_v34 = vsel %vm724_vm5, %v721_v20, %v717_v31  ;;  %v753_v35 = vpop.permute.xlu2 %752  ;;  %v3172_v31 = vmov 21  }
 0x142   : > { %1098 = vrot.lane.b32.xlu0 %v2218_v37, %s2039_s19  ;;  %1102 = vrot.lane.b32.xlu1 %v2226_v32, %s2039_s19 }
 0x143   : > { %1066 = vrot.lane.b32.xlu2 %v2226_v32, %s2041_s22 }
 0x144   : > { %v921_v38 = vpop.permute.xlu1 %920  ;;  %v757_v39 = vpop.permute.xlu0 %756 }
 0x145   : > { %v2409_v42 = vsel %vm760_vm6, %v753_v35, %v757_v39  ;;  %v2413_v43 = vsel %vm760_vm6, %v757_v39, %v753_v35  ;;  %v793_v40 = vpop.permute.xlu2 %792 }
 0x146   : > { %3209 = vst [vmem:[#allocation5_spill] sm:$0xff] %v2409_v42  ;;  %v2417_v45 = vsel %vm796_vm7, %v789_v30, %v793_v40  ;;  %v2421_v49 = vsel %vm796_vm7, %v793_v40, %v789_v30  ;;  %v2048_v30 = vmov 12  }
 0x147   : > { %3210 = vst [vmem:[#allocation6_spill] sm:$0xff] %v2413_v43 }
 0x14a   : > { %1138 = vrot.lane.b32.xlu0 %v2226_v32, %s2040_s20  ;;  %781 = vperm.xlu1 %1900, %v2135_v0  }
 0x14b   : > { %1134 = vrot.lane.b32.xlu2 %v2218_v37, %s2040_s20 }
 0x14c   : > { %v989_v50 = vpop.permute.xlu1 %988  ;;  %v917_v51 = vpop.permute.xlu0 %916 }
 0x14d   : > { %v2431_v57 = vsel %vm924_vm8, %v917_v51, %v921_v38  ;;  %v2435_v58 = vsel %vm924_vm8, %v921_v38, %v917_v51  ;;  %v953_v59 = vpop.permute.xlu2 %952  ;;  %v2050_v51 = vmov 24  }
 0x14e   : > { %3211 = vst [vmem:[#allocation7_spill] sm:$0xff] %v2431_v57 }
 0x14f   : > { %3212 = vst [vmem:[#allocation8_spill] sm:$0xff] %v2435_v58  ;;  %v2676_v58 = vld [vmem:[%s3163_s8 + $0x10] ss:$8 sm:$0x3] }
 0x150   : > { %3231 = vst [vmem:[#allocation20_spill] sm:$0xff] %v2676_v58 }
 0x152   : > { %893 = vperm.xlu0 %1902, %v2141_v3   ;;  %1903 = vset.pattern.permute.xlu1 %v2044_v60 }
 0x153   : > { %817 = vperm.xlu2 %1901, %v2135_v0   ;;  %909 = vperm.xlu1 %1903, %v2135_v0  }
 0x154   : > { %v1029_v61 = vpop.permute.xlu1 %1028  ;;  %v957_v62 = vpop.permute.xlu0 %956 }
 0x155   : > { %v2444_v63 = vsel %vm960_vm9, %v953_v59, %v957_v62  ;;  %v2448_v1 = vsel %vm960_vm9, %v957_v62, %v953_v59  ;;  %v993_v5 = vpop.permute.xlu2 %992 }
 0x156   : > { %3213 = vst [vmem:[#allocation9_spill] sm:$0xff] %v2444_v63  ;;  %v2452_v6 = vsel %vm996_vm10, %v989_v50, %v993_v5  ;;  %v2456_v7 = vsel %vm996_vm10, %v993_v5, %v989_v50 }
 0x157   : > { %3214 = vst [vmem:[#allocation10_spill] sm:$0xff] %v2452_v6 }
 0x158   : > { %3215 = vst [vmem:[#allocation11_spill] sm:$0xff] %v2456_v7 }
 0x15a   : > { %1907 = vset.pattern.permute.xlu0 %v3169_v8 }
 0x15b   : > { %1904 = vset.pattern.permute.xlu2 %v2046_v11  ;;  %1053 = vperm.xlu0 %1907, %v2135_v0  }
 0x15c   : > { %945 = vperm.xlu2 %1904, %v2135_v0   ;;  %1905 = vset.pattern.permute.xlu1 %v3174_v14  ;;  %v1097_v15 = vpop.permute.xlu1 %1096  ;;  %v1025_v18 = vpop.permute.xlu0 %1024 }
 0x15d   : > { %v2466_v20 = vsel %vm1032_vm11, %v1025_v18, %v1029_v61  ;;  %v2470_v22 = vsel %vm1032_vm11, %v1029_v61, %v1025_v18  ;;  %v1061_v27 = vpop.permute.xlu2 %1060  ;;  %981 = vperm.xlu1 %1905, %v2135_v0  }
 0x15e   : > { %3216 = vst [vmem:[#allocation12_spill] sm:$0xff] %v2466_v20  ;;  %v3181_v20 = vmov 5  }
 0x15f   : > { %3217 = vst [vmem:[#allocation13_spill] sm:$0xff] %v2470_v22 }
 0x163   : > { %1908 = vset.pattern.permute.xlu0 %v2048_v30 }
 0x164   : > { %1906 = vset.pattern.permute.xlu2 %v3172_v31  ;;  %v1137_v35 = vpop.permute.xlu1 %1136  ;;  %v1065_v38 = vpop.permute.xlu0 %1064  ;;  %673 = vperm.xlu0 %1908, %v2135_v0  }
 0x165   : > { %v2479_v39 = vsel %vm1068_vm12, %v1061_v27, %v1065_v38  ;;  %v2483_v40 = vsel %vm1068_vm12, %v1065_v38, %v1061_v27  ;;  %v1101_v50 = vpop.permute.xlu2 %1100  ;;  %1017 = vperm.xlu2 %1906, %v2135_v0   ;;  %1909 = vset.pattern.permute.xlu1 %v2050_v51  ;;  %v3170_v38 = vmov 25  }
 0x166   : > { %3218 = vst [vmem:[#allocation14_spill] sm:$0xff] %v2479_v39  ;;  %v2488_v59 = vsel %vm1104_vm13, %v1097_v15, %v1101_v50  ;;  %v2492_v61 = vsel %vm1104_vm13, %v1101_v50, %v1097_v15  ;;  %1089 = vperm.xlu1 %1909, %v2135_v0   ;;  %v3171_v15 = vmov 26  }
 0x167   : > { %3219 = vst [vmem:[#allocation15_spill] sm:$0xff] %v2483_v40 }
 0x168   : > { %3220 = vst [vmem:[#allocation16_spill] sm:$0xff] %v2488_v59 }
 0x169   : > { %3221 = vst [vmem:[#allocation17_spill] sm:$0xff] %v2492_v61 }
 0x16c   : > { %v1133_v62 = vpop.permute.xlu0 %1132  ;;  %669 = vperm.xlu0 %1908, %v2141_v3   ;;  %v574_v5 = vpop.permute.xlu1 %573 }
 0x16d   : > { %v2499_v18 = vsel %vm1140_vm14, %v1133_v62, %v1137_v35  ;;  %v2503_v27 = vsel %vm1140_vm14, %v1137_v35, %v1133_v62  ;;  %v651_v30 = vpop.permute.xlu2 %650  ;;  %1910 = vset.pattern.permute.xlu2 %v3170_v38 }
 0x16e   : > { %3222 = vst [vmem:[#allocation18_spill] sm:$0xff] %v2499_v18  ;;  %1125 = vperm.xlu2 %1910, %v2135_v0   ;;  %1911 = vset.pattern.permute.xlu1 %v3171_v15 }
 0x16f   : > { %3223 = vst [vmem:[#allocation19_spill] sm:$0xff] %v2503_v27  ;;  %1161 = vperm.xlu1 %1911, %v2135_v0  }
 0x174   : > { %v578_v50 = vpop.permute.xlu0 %577  ;;  %1917 = vset.pattern.permute.xlu0 %v2044_v60  ;;  %v611_v2 = vpop.permute.xlu1 %610 }
 0x175   : > { %v583_v8 = vsel %vm581_vm1, %v574_v5, %v578_v50  ;;  %v585_v35 = vsel %vm581_vm1, %v578_v50, %v574_v5  ;;  %v719_v62 = vpop.permute.xlu2 %718  ;;  %905 = vperm.xlu0 %1917, %v2141_v3  }
 0x176   : > { %v594_v38 = vmul.f32 %v588_v55, %v585_v35  ;;  %v595_v15 = vmul.f32 %v589_v56, %v583_v8  ;;  %1912 = vset.pattern.permute.xlu2 %v2025_v21 }
 0x177   : > { %633 = vperm.xlu2 %1912, %v2141_v3   ;;  %1913 = vset.pattern.permute.xlu1 %v2027_v25 }
 0x178   : > { %v606_v60 = vmul.f32 %v2271_v41, %v594_v38  ;;  %v607_v31 = vmul.f32 %v2271_v41, %v595_v15  ;;  %705 = vperm.xlu1 %1913, %v2141_v3  }
 0x17a   : > { %v2525_v5 = vadd.f32 %v606_v60, %v2230_v44  ;;  %v2528_v55 = vadd.f32 %v607_v31, %v2233_v46 }
 0x17c   : > { %v615_v53 = vpop.permute.xlu0 %614  ;;  %v647_v56 = vpop.permute.xlu1 %646 }
 0x17d   : > { %v2532_v21 = vsel %vm616_vm2, %v611_v2, %v615_v53  ;;  %v2536_v25 = vsel %vm616_vm2, %v615_v53, %v611_v2  ;;  %v759_v8 = vpop.permute.xlu2 %758  ;;  %v2540_v41 = vsel %vm652_vm3, %v647_v56, %v651_v30  ;;  %v2544_v44 = vsel %vm652_vm3, %v651_v30, %v647_v56  ;;  %1922 = vset.pattern.permute.xlu0 %v2050_v51  ;;  %v2567_v51 = vld [vmem:[%s3163_s8 + $0x4] ss:$8 sm:$0x3] }
 0x17e   : > { %1085 = vperm.xlu0 %1922, %v2141_v3   ;;  %v3177_v35 = vperm.slane %v2567_v51, 0 }
 0x17f   : > { %1914 = vset.pattern.permute.xlu2 %v2026_v24  ;;  %v2560_v24 = vld [vmem:[%s3163_s8 + $0x3] ss:$8 sm:$0x3] }
 0x180   : > { %741 = vperm.xlu2 %1914, %v2141_v3   ;;  %1915 = vset.pattern.permute.xlu1 %v2042_v13  ;;  %v3173_v13 = vmov 18   ;;  %v3176_v15 = vperm.slane %v2560_v24, 0  ;;  %v3175_v50 = vperm.slane %v2560_v24, 1 }
 0x181   : > { %777 = vperm.xlu1 %1915, %v2141_v3  }
 0x184   : > { %v683_v2 = vpop.permute.xlu0 %682  ;;  %v687_v46 = vpop.permute.xlu1 %686 }
 0x185   : > { %v919_v31 = vpop.permute.xlu2 %918  ;;  %v690_v38 = vsel %vm688_vm4, %v683_v2, %v687_v46  ;;  %v692_v30 = vsel %vm688_vm4, %v687_v46, %v683_v2 }
 0x186   : > { %1170 = vrot.lane.b32.xlu0 %v2218_v37, %s2053_s26  ;;  %v703_v53 = vmul.f32 %v3175_v50, %v690_v38 }
 0x187   : > { %1925 = vset.pattern.permute.xlu0 %v3173_v13 }
 0x188   : > { %1916 = vset.pattern.permute.xlu2 %v2043_v19  ;;  %v702_v19 = vmul.f32 %v3176_v15, %v692_v30  ;;  %v3224_v30 = vperm.slane %v2567_v51, 1 }
 0x189   : > { %813 = vperm.xlu2 %1916, %v2141_v3   ;;  %1918 = vset.pattern.permute.xlu1 %v2046_v11 }
 0x18a   : > { %941 = vperm.xlu1 %1918, %v2141_v3  }
 0x18c   : > { %v723_v56 = vpop.permute.xlu0 %722  ;;  %v755_v2 = vpop.permute.xlu1 %754 }
 0x18d   : > { %v959_v46 = vpop.permute.xlu2 %958  ;;  %v726_v11 = vsel %vm724_vm5, %v719_v62, %v723_v56  ;;  %v728_v13 = vsel %vm724_vm5, %v723_v56, %v719_v62  ;;  %v2586_v14 = vsel %vm760_vm6, %v755_v2, %v759_v8  ;;  %v2590_v60 = vsel %vm760_vm6, %v759_v8, %v755_v2 }
 0x18e   : > { %v738_v38 = vmul.f32 %v3177_v35, %v726_v11  ;;  %v739_v50 = vmul.f32 %v3224_v30, %v728_v13  ;;  %828 = vrot.lane.b32.xlu0 %v2215_v36, %s2055_s12  ;;  %v714_v62 = vmul.f32 %v2335_v4, %v702_v19  ;;  %v715_v56 = vmul.f32 %v2335_v4, %v703_v53 }
 0x18f   : > { %v3225_v8 = vmov 20   ;;  %v3226_v13 = vmov 21  }
 0x190   : > { %v750_v15 = vmul.f32 %v2293_v48, %v738_v38  ;;  %v751_v61 = vmul.f32 %v2293_v48, %v739_v50 }
 0x191   : > { %1919 = vset.pattern.permute.xlu2 %v3225_v8 }
 0x192   : > { %v2603_v2 = vadd.f32 %v750_v15, %v714_v62  ;;  %v2605_v11 = vadd.f32 %v751_v61, %v715_v56  ;;  %977 = vperm.xlu2 %1919, %v2141_v3   ;;  %1920 = vset.pattern.permute.xlu1 %v3226_v13  ;;  %v3227_v15 = vmov 22   ;;  %v3228_v61 = vmov 25  }
 0x193   : > { %1013 = vperm.xlu1 %1920, %v2141_v3  }
 0x194   : > { %v791_v30 = vpop.permute.xlu0 %790  ;;  %v795_v19 = vpop.permute.xlu1 %794 }
 0x195   : > { %v1027_v35 = vpop.permute.xlu2 %1026  ;;  %v798_v4 = vsel %vm796_vm7, %v791_v30, %v795_v19  ;;  %v800_v48 = vsel %vm796_vm7, %v795_v19, %v791_v30  ;;  %v3178_v30 = vmov 6   ;;  %v3229_v19 = vmov 26  }
 0x196   : > { %853 = vperm.xlu0 %1925, %v2135_v0  }
 0x19a   : > { %1921 = vset.pattern.permute.xlu2 %v3227_v15 }
 0x19b   : > { %1049 = vperm.xlu2 %1921, %v2141_v3   ;;  %1923 = vset.pattern.permute.xlu1 %v3228_v61 }
 0x19c   : > { %1121 = vperm.xlu1 %1923, %v2141_v3   ;;  %v923_v50 = vpop.permute.xlu0 %922  ;;  %v955_v53 = vpop.permute.xlu1 %954 }
 0x19d   : > { %v1067_v38 = vpop.permute.xlu2 %1066  ;;  %v926_v62 = vsel %vm924_vm8, %v919_v31, %v923_v50  ;;  %v928_v56 = vsel %vm924_vm8, %v923_v50, %v919_v31  ;;  %v2625_v8 = vsel %vm960_vm9, %v955_v53, %v959_v46  ;;  %v2629_v13 = vsel %vm960_vm9, %v959_v46, %v955_v53 }
 0x19e   : > { %1929 = vset.pattern.permute.xlu0 %v3178_v30  ;;  %v2057_v53 = vmov 27  }
 0x19f   : > { %1345 = vperm.xlu0 %1929, %v2135_v0  }
 0x1a3   : > { %1924 = vset.pattern.permute.xlu2 %v3229_v19  ;;  %v2644_v19 = vld [vmem:[%s3163_s8 + $0x6] ss:$8 sm:$0x3] }
 0x1a4   : > { %1157 = vperm.xlu2 %1924, %v2141_v3   ;;  %826 = vrot.lane.b32.xlu1 %v2218_v37, %s2055_s12  ;;  %v991_v31 = vpop.permute.xlu0 %990  ;;  %v995_v15 = vpop.permute.xlu1 %994  ;;  %v3180_v30 = vperm.slane %v2644_v19, 0  ;;  %v3179_v59 = vperm.slane %v2644_v19, 1 }
 0x1a5   : > { %v1135_v61 = vpop.permute.xlu2 %1134  ;;  %v998_v50 = vsel %vm996_vm10, %v991_v31, %v995_v15  ;;  %v1000_v46 = vsel %vm996_vm10, %v995_v15, %v991_v31  ;;  %1926 = vset.pattern.permute.xlu1 %v2057_v53 }
 0x1a6   : > { %v810_v6 = vmul.f32 %v3180_v30, %v798_v4  ;;  %v811_v7 = vmul.f32 %v3179_v59, %v800_v48  ;;  %v3230_v59 = vmov 18  }
 0x1a7   : > { %1934 = vset.pattern.permute.xlu0 %v3181_v20 }
 0x1a8   : > { %1249 = vperm.xlu0 %1934, %v2141_v3  }
 0x1ac   : > { %830 = vrot.lane.b32.xlu2 %v2226_v32, %s2055_s12  ;;  %1174 = vrot.lane.b32.xlu1 %v2226_v32, %s2053_s26  ;;  %v1031_v31 = vpop.permute.xlu0 %1030  ;;  %v1063_v15 = vpop.permute.xlu1 %1062 }
 0x1ad   : > { %v818_v53 = vpop.permute.xlu2 %817  ;;  %v2658_v27 = vsel %vm1032_vm11, %v1027_v35, %v1031_v31  ;;  %v2662_v18 = vsel %vm1032_vm11, %v1031_v31, %v1027_v35  ;;  %v2666_v4 = vsel %vm1068_vm12, %v1063_v15, %v1067_v38  ;;  %v2670_v48 = vsel %vm1068_vm12, %v1067_v38, %v1063_v15  ;;  %1927 = vset.pattern.permute.xlu2 %v3230_v59 }
 0x1ae   : > { %v822_v30 = vmul.f32 %v818_v53, %v810_v6  ;;  %v823_v57 = vmul.f32 %v818_v53, %v811_v7  ;;  %v3184_v35 = vperm.slane %v2676_v58, 0  ;;  %v3183_v31 = vperm.slane %v2676_v58, 1  ;;  %v2697_v53 = vld [vmem:[%s3163_s8 + $0x5] ss:$8 sm:$0x3] }
 0x1af   : > { %3232 = vst [vmem:[#allocation21_spill] sm:$0xff] %v2697_v53  ;;  %v3188_v40 = vperm.slane %v2697_v53, 0 }
 0x1b0   : > { %v938_v59 = vmul.f32 %v3184_v35, %v928_v56  ;;  %v939_v38 = vmul.f32 %v3183_v31, %v926_v62  ;;  %v3187_v56 = vperm.slane %v2697_v53, 1  ;;  %v2704_v62 = vld [vmem:[%s3163_s8 + $0x12] ss:$8 sm:$0x3]  ;;  %v3234_v31 = vmov 0  }
 0x1b1   : > { %3233 = vst [vmem:[#allocation22_spill] sm:$0xff] %v2704_v62  ;;  %1937 = vset.pattern.permute.xlu0 %v3234_v31 }
 0x1b4   : > { %824 = vrot.lane.b32.xlu2 %v2195_v12, %s2055_s12  ;;  %1168 = vrot.lane.b32.xlu1 %v2195_v12, %s2053_s26  ;;  %v1099_v6 = vpop.permute.xlu0 %1098  ;;  %v1103_v7 = vpop.permute.xlu1 %1102 }
 0x1b5   : > { %v1106_v3 = vsel %vm1104_vm13, %v1099_v6, %v1103_v7  ;;  %v1108_v15 = vsel %vm1104_vm13, %v1103_v7, %v1099_v6  ;;  %v774_v6 = vmul.f32 %v3188_v40, %v2586_v14  ;;  %v775_v7 = vmul.f32 %v3187_v56, %v2590_v60 }
 0x1b6   : > { %v946_v20 = vpop.permute.xlu2 %945 }
 0x1b7   : > { %v950_v12 = vmul.f32 %v946_v20, %v938_v59  ;;  %v951_v22 = vmul.f32 %v946_v20, %v939_v38  ;;  %v3197_v20 = vperm.slane %v2704_v62, 0  ;;  %v3196_v59 = vperm.slane %v2704_v62, 1 }
 0x1b9   : > { %v1010_v40 = vmul.f32 %v3197_v20, %v1000_v46  ;;  %v902_v46 = vmul.f32 %v2308_v54, %v2218_v37 }
 0x1bc   : > { %1172 = vrot.lane.b32.xlu2 %v2215_v36, %s2053_s26  ;;  %1197 = vperm.xlu1 %1926, %v2135_v0   ;;  %v1139_v38 = vpop.permute.xlu0 %1138  ;;  %v782_v35 = vpop.permute.xlu1 %781  ;;  %v1011_v36 = vmul.f32 %v3196_v59, %v998_v50 }
 0x1bd   : > { %v2720_v58 = vsel %vm1140_vm14, %v1135_v61, %v1139_v38  ;;  %v2724_v14 = vsel %vm1140_vm14, %v1139_v38, %v1135_v61  ;;  %v786_v60 = vmul.f32 %v782_v35, %v774_v6  ;;  %v787_v56 = vmul.f32 %v782_v35, %v775_v7  ;;  %v2739_v61 = vld [vmem:[%s3163_s8 + $0x15] ss:$8 sm:$0x3]  ;;  %v2766_v6 = vld [vmem:[%s3163_s8 + $0x11] ss:$8 sm:$0x3] }
 0x1be   : > { %3235 = vst [vmem:[#allocation23_spill] sm:$0xff] %v2739_v61 }
 0x1bf   : > { %v874_v39 = vadd.f32 %v822_v30, %v786_v60  ;;  %v875_v0 = vadd.f32 %v823_v57, %v787_v56  ;;  %v1018_v43 = vpop.permute.xlu2 %1017  ;;  %v903_v57 = vmul.f32 %v2308_v54, %v2226_v32  ;;  %v1796_v30 = vld [vmem:[%s3163_s8 + $0x1] ss:$8 sm:$0x3] }
 0x1c0   : > { %v1022_v53 = vmul.f32 %v1018_v43, %v1010_v40  ;;  %v1023_v42 = vmul.f32 %v1018_v43, %v1011_v36  ;;  %v2748_v36 = vld [vmem:[%s3157_s2] sm:$0xff]  ;;  %v3194_v40 = vperm.slane %v2739_v61, 1  ;;  %v625_v60 = vperm.slane %v1796_v30, 1 }
 0x1c1   : > { %v2731_v63 = vadd.f32 %v874_v39, %v2603_v2  ;;  %v2734_v52 = vadd.f32 %v875_v0, %v2605_v11  ;;  %v3195_v39 = vperm.slane %v2739_v61, 0  ;;  %v3198_v0 = vperm.slane %v2766_v6, 1 }
 0x1c2   : > { %v1119_v54 = vmul.f32 %v3194_v40, %v1108_v15  ;;  %v3199_v15 = vperm.slane %v2766_v6, 0 }
 0x1c3   : > { %v1118_v32 = vmul.f32 %v3195_v39, %v1106_v3  ;;  %v624_v3 = vperm.slane %v1796_v30, 0  ;;  %v2795_v30 = vld [vmem:[%s3163_s8 + $0x13] ss:$8 sm:$0x3] }
 0x1c4   : > { %849 = vperm.xlu2 %1927, %v2748_v36   ;;  %1193 = vperm.xlu1 %1926, %v2748_v36   ;;  %v2752_v43 = vpop.permute.xlu0 %893  ;;  %v1040_v61 = vperm.slane %v2795_v30, 0 }
 0x1c5   : > { %v910_v2 = vpop.permute.xlu1 %909 }
 0x1c6   : > { %v914_v37 = vadd.f32 %v910_v2, %v902_v46  ;;  %v915_v11 = vadd.f32 %v910_v2, %v903_v57  ;;  %v2059_v46 = vmov 4   ;;  %v974_v57 = vmul.f32 %v3199_v15, %v2629_v13 }
 0x1c7   : > { %v975_v2 = vmul.f32 %v3198_v0, %v2625_v8  ;;  %v2800_v8 = vld [vmem:[%s3163_s8 + $0x14] ss:$8 sm:$0x3] }
 0x1c8   : > { %v1206_v50 = vadd.f32 %v950_v12, %v914_v37  ;;  %v1207_v35 = vadd.f32 %v951_v22, %v915_v11  ;;  %v1126_v56 = vpop.permute.xlu2 %1125  ;;  %v2777_v12 = vld [vmem:[%s3157_s2 + $0x8] sm:$0xff]  ;;  %v628_v11 = vmul.f32 %v624_v3, %v2357_v17  ;;  %v630_v17 = vmul.f32 %v624_v3, %v2536_v25 }
 0x1c9   : > { %v2768_v7 = vmul.f32 %v1126_v56, %v1118_v32  ;;  %v2770_v38 = vmul.f32 %v1126_v56, %v1119_v54  ;;  %v629_v32 = vmul.f32 %v625_v60, %v2353_v16  ;;  %v1797_v54 = vld [vmem:[%s3163_s8 + $0x2] ss:$8 sm:$0x3]  ;;  %v631_v16 = vmul.f32 %v625_v60, %v2532_v21 }
 0x1ca   : > { %v660_v0 = vperm.slane %v1797_v54, 0  ;;  %v661_v15 = vperm.slane %v1797_v54, 1  ;;  %v1077_v25 = vperm.slane %v2800_v8, 1  ;;  %v642_v21 = vmul.f32 %v2279_v47, %v630_v17 }
 0x1cb   : > { %v3236_v3 = vmov 5   ;;  %v3237_v60 = vmov 6  }
 0x1cc   : > { %1928 = vset.pattern.permute.xlu2 %v2059_v46  ;;  %1930 = vset.pattern.permute.xlu1 %v2059_v46 }
 0x1cd   : > { %1241 = vperm.xlu2 %1928, %v2777_v12   ;;  %1237 = vperm.xlu1 %1930, %v2748_v36   ;;  %v1054_v22 = vpop.permute.xlu0 %1053 }
 0x1cf   : > { %v982_v37 = vpop.permute.xlu1 %981 }
 0x1d0   : > { %v986_v56 = vmul.f32 %v982_v37, %v974_v57  ;;  %v987_v13 = vmul.f32 %v982_v37, %v975_v2  ;;  %v1041_v57 = vperm.slane %v2795_v30, 1  ;;  %v1076_v2 = vperm.slane %v2800_v8, 0  ;;  %v3257_v30 = vld [vmem:[#allocation20_spill] sm:$0xff] }
 0x1d1   : > { %v634_v46 = vpop.permute.xlu2 %633 }
 0x1d2   : > { %v1210_v40 = vadd.f32 %v1022_v53, %v986_v56  ;;  %v1211_v39 = vadd.f32 %v1023_v42, %v987_v13  ;;  %v640_v59 = vmul.f32 %v634_v46, %v628_v11  ;;  %v641_v20 = vmul.f32 %v634_v46, %v629_v32 }
 0x1d3   : > { %v666_v42 = vmul.f32 %v660_v0, %v2544_v44  ;;  %v667_v53 = vmul.f32 %v661_v15, %v2540_v41  ;;  %v643_v11 = vmul.f32 %v2279_v47, %v631_v16  ;;  %v1082_v41 = vmul.f32 %v1076_v2, %v2666_v4 }
 0x1d4   : > { %v2807_v37 = vadd.f32 %v1210_v40, %v1206_v50  ;;  %v2809_v62 = vadd.f32 %v1211_v39, %v1207_v35  ;;  %v1046_v40 = vmul.f32 %v1040_v61, %v2662_v18  ;;  %v1047_v39 = vmul.f32 %v1041_v57, %v2658_v27 }
 0x1d5   : > { %1931 = vset.pattern.permute.xlu2 %v3236_v3  ;;  %1932 = vset.pattern.permute.xlu1 %v3237_v60  ;;  %v1083_v47 = vmul.f32 %v1077_v25, %v2670_v48  ;;  %v3238_v16 = vperm.slane %v2567_v51, 0  ;;  %v3239_v4 = vperm.slane %v2567_v51, 1  ;;  %v2841_v48 = vld [vmem:[%s3163_s8 + $0x16] ss:$8 sm:$0x3] }
 0x1d6   : > { %1253 = vperm.xlu2 %1931, %v2777_v12   ;;  %1341 = vperm.xlu1 %1932, %v2748_v36   ;;  %v674_v44 = vpop.permute.xlu0 %673  ;;  %v1058_v18 = vmul.f32 %v1054_v22, %v1046_v40  ;;  %v1059_v32 = vmul.f32 %v1054_v22, %v1047_v39  ;;  %v665_v39 = vmul.f32 %v661_v15, %v2370_v23 }
 0x1d7   : > { %v678_v50 = vmul.f32 %v674_v44, %v666_v42  ;;  %v679_v35 = vmul.f32 %v674_v44, %v667_v53  ;;  %v736_v46 = vmul.f32 %v3238_v16, %v2393_v33  ;;  %v737_v3 = vmul.f32 %v3239_v4, %v2397_v34 }
 0x1d8   : > { %v1090_v54 = vpop.permute.xlu1 %1089  ;;  %v664_v33 = vmul.f32 %v660_v0, %v2374_v26  ;;  %v1148_v44 = vperm.slane %v2841_v48, 0 }
 0x1d9   : > { %v866_v56 = vadd.f32 %v678_v50, %v642_v21  ;;  %v867_v27 = vadd.f32 %v679_v35, %v643_v11  ;;  %v1094_v13 = vmul.f32 %v1090_v54, %v1082_v41  ;;  %v1095_v17 = vmul.f32 %v1090_v54, %v1083_v47 }
 0x1da   : > { %v742_v60 = vpop.permute.xlu2 %741  ;;  %v2060_v41 = vmov 7   ;;  %v1154_v23 = vmul.f32 %v1148_v44, %v2720_v58  ;;  %v3240_v50 = vperm.slane %v2644_v19, 0 }
 0x1db   : > { %v878_v22 = vadd.f32 %v866_v56, %v2525_v5  ;;  %v879_v21 = vadd.f32 %v867_v27, %v2528_v55  ;;  %v1214_v42 = vadd.f32 %v1094_v13, %v1058_v18  ;;  %v1215_v53 = vadd.f32 %v1095_v17, %v1059_v32 }
 0x1dc   : > { %v748_v11 = vmul.f32 %v742_v60, %v736_v46  ;;  %v749_v40 = vmul.f32 %v742_v60, %v737_v3  ;;  %v1149_v5 = vperm.slane %v2841_v48, 1  ;;  %v808_v35 = vmul.f32 %v3240_v50, %v2417_v45  ;;  %v3245_v60 = vld [vmem:[#allocation9_spill] sm:$0xff]  ;;  %v3255_v50 = vld [vmem:[#allocation12_spill] sm:$0xff] }
 0x1dd   : > { %v2848_v34 = vadd.f32 %v2731_v63, %v878_v22  ;;  %v2851_v51 = vadd.f32 %v2734_v52, %v879_v21  ;;  %v3241_v18 = vperm.slane %v2644_v19, 1  ;;  %v3244_v3 = vperm.slane %v2766_v6, 0 }
 0x1de   : > { %1933 = vset.pattern.permute.xlu2 %v2060_v41  ;;  %1935 = vset.pattern.permute.xlu1 %v2060_v41  ;;  %v670_v55 = vpop.permute.xlu0 %669  ;;  %v1155_v52 = vmul.f32 %v1149_v5, %v2724_v14  ;;  %v3247_v41 = vld [vmem:[#allocation5_spill] sm:$0xff] }
 0x1df   : > { %1357 = vperm.xlu2 %1933, %v2777_v12   ;;  %v676_v47 = vmul.f32 %v670_v55, %v664_v33  ;;  %v677_v26 = vmul.f32 %v670_v55, %v665_v39  ;;  %1353 = vperm.xlu1 %1935, %v2748_v36   ;;  %v809_v32 = vmul.f32 %v3241_v18, %v2421_v49  ;;  %v3248_v55 = vld [vmem:[#allocation21_spill] sm:$0xff] }
 0x1e1   : > { %v864_v63 = vadd.f32 %v676_v47, %v640_v59  ;;  %v865_v15 = vadd.f32 %v677_v26, %v641_v20  ;;  %v1162_v0 = vpop.permute.xlu1 %1161  ;;  %v3250_v47 = vld [vmem:[#allocation6_spill] sm:$0xff]  ;;  %v3251_v26 = vperm.slane %v3248_v55, 1 }
 0x1e2   : > { %v1166_v54 = vmul.f32 %v1162_v0, %v1154_v23  ;;  %v1167_v56 = vmul.f32 %v1162_v0, %v1155_v52  ;;  %v3252_v52 = vld [vmem:[#allocation14_spill] sm:$0xff] }
 0x1e3   : > { %v876_v27 = vadd.f32 %v864_v63, %v2337_v9  ;;  %v877_v58 = vadd.f32 %v865_v15, %v2339_v10  ;;  %v814_v13 = vpop.permute.xlu2 %813  ;;  %v3242_v10 = vperm.slane %v2560_v24, 0  ;;  %v773_v23 = vmul.f32 %v3251_v26, %v3250_v47  ;;  %v3253_v63 = vld [vmem:[#allocation15_spill] sm:$0xff]  ;;  %v3254_v15 = vld [vmem:[#allocation13_spill] sm:$0xff] }
 0x1e4   : > { %v1218_v14 = vadd.f32 %v1166_v54, %v2768_v7  ;;  %v1219_v20 = vadd.f32 %v1167_v56, %v2770_v38  ;;  %v820_v59 = vmul.f32 %v814_v13, %v808_v35  ;;  %v821_v17 = vmul.f32 %v814_v13, %v809_v32 }
 0x1e5   : > { %v700_v19 = vmul.f32 %v3242_v10, %v2382_v29  ;;  %v3243_v7 = vperm.slane %v2560_v24, 1  ;;  %v3249_v24 = vperm.slane %v3248_v55, 0  ;;  %v1044_v0 = vmul.f32 %v1040_v61, %v3254_v15 }
 0x1e6   : > { %v1226_v16 = vadd.f32 %v1218_v14, %v1214_v42  ;;  %v1227_v46 = vadd.f32 %v1219_v20, %v1215_v53  ;;  %v1045_v35 = vmul.f32 %v1041_v57, %v3255_v50  ;;  %v3258_v57 = vperm.slane %v3257_v30, 0 }
 0x1e7   : > { %1938 = vset.pattern.permute.xlu2 %v3234_v31  ;;  %1936 = vset.pattern.permute.xlu1 %v3234_v31  ;;  %v906_v45 = vpop.permute.xlu0 %905  ;;  %v701_v38 = vmul.f32 %v3243_v7, %v2378_v28  ;;  %v972_v31 = vmul.f32 %v3244_v3, %v2448_v1  ;;  %v772_v28 = vmul.f32 %v3249_v24, %v3247_v41  ;;  %v3256_v7 = vld [vmem:[#allocation8_spill] sm:$0xff]  ;;  %v3260_v3 = vperm.slane %v3257_v30, 1 }
 0x1e8   : > { %v2876_v49 = vadd.f32 %v1226_v16, %v2807_v37  ;;  %v2879_v9 = vadd.f32 %v1227_v46, %v2809_v62  ;;  %v3246_v37 = vperm.slane %v2766_v6, 1  ;;  %v1080_v6 = vmul.f32 %v1076_v2, %v3252_v52 }
 0x1ea   : > { %v706_v4 = vpop.permute.xlu1 %705  ;;  %v973_v22 = vmul.f32 %v3246_v37, %v3245_v60  ;;  %v3262_v60 = vld [vmem:[#allocation3_spill] sm:$0xff] }
 0x1eb   : > { %v712_v21 = vmul.f32 %v706_v4, %v700_v19  ;;  %v713_v62 = vmul.f32 %v706_v4, %v701_v38  ;;  %v936_v38 = vmul.f32 %v3258_v57, %v3256_v7  ;;  %v3259_v4 = vld [vmem:[#allocation7_spill] sm:$0xff]  ;;  %v901_v37 = vmul.f32 %v2752_v43, %v3262_v60 }
 0x1ec   : > { %v978_v42 = vpop.permute.xlu2 %977  ;;  %v1802_v60 = vld [vmem:[%s3163_s8 + $0x7] ss:$8 sm:$0x3] }
 0x1ed   : > { %v868_v53 = vadd.f32 %v748_v11, %v712_v21  ;;  %v869_v33 = vadd.f32 %v749_v40, %v713_v62  ;;  %v984_v39 = vmul.f32 %v978_v42, %v972_v31  ;;  %v985_v29 = vmul.f32 %v978_v42, %v973_v22  ;;  %v3263_v22 = vld [vmem:[#allocation18_spill] sm:$0xff] }
 0x1ee   : > { %v1081_v11 = vmul.f32 %v1077_v25, %v3253_v63  ;;  %v937_v31 = vmul.f32 %v3260_v3, %v3259_v4 }
 0x1f0   : > { %v1086_v1 = vpop.permute.xlu0 %1085 }
 0x1f1   : > { %v1092_v54 = vmul.f32 %v1086_v1, %v1080_v6  ;;  %v1093_v56 = vmul.f32 %v1086_v1, %v1081_v11  ;;  %v3268_v6 = vld [vmem:[#allocation10_spill] sm:$0xff] }
 0x1f3   : > { %v778_v40 = vpop.permute.xlu1 %777 }
 0x1f4   : > { %v784_v18 = vmul.f32 %v778_v40, %v772_v28  ;;  %v785_v32 = vmul.f32 %v778_v40, %v773_v23  ;;  %v3265_v23 = vld [vmem:[#allocation11_spill] sm:$0xff] }
 0x1f5   : > { %v1050_v13 = vpop.permute.xlu2 %1049 }
 0x1f6   : > { %v872_v14 = vadd.f32 %v820_v59, %v784_v18  ;;  %v873_v2 = vadd.f32 %v821_v17, %v785_v32  ;;  %v1056_v20 = vmul.f32 %v1050_v13, %v1044_v0  ;;  %v1057_v16 = vmul.f32 %v1050_v13, %v1045_v35  ;;  %v3261_v59 = vld [vmem:[#allocation2_spill] sm:$0xff]  ;;  %v3270_v35 = vld [vmem:[#allocation16_spill] sm:$0xff]  ;;  %v3271_v18 = vld [vmem:[#allocation23_spill] sm:$0xff] }
 0x1f7   : > { %v900_v17 = vmul.f32 %v2752_v43, %v3261_v59  ;;  %v3266_v43 = vld [vmem:[#allocation22_spill] sm:$0xff]  ;;  %v3272_v32 = vperm.slane %v3271_v18, 0  ;;  %v3274_v13 = vperm.slane %v3271_v18, 1 }
 0x1f8   : > { %v880_v8 = vadd.f32 %v872_v14, %v868_v53  ;;  %v881_v25 = vadd.f32 %v873_v2, %v869_v33  ;;  %v1212_v46 = vadd.f32 %v1092_v54, %v1056_v20  ;;  %v1213_v10 = vadd.f32 %v1093_v56, %v1057_v16  ;;  %v3273_v56 = vld [vmem:[#allocation17_spill] sm:$0xff]  ;;  %v1171_v30 = vpop.permute.xlu0 %1170 }
 0x1f9   : > { %v912_v42 = vadd.f32 %v906_v45, %v900_v17  ;;  %v913_v53 = vadd.f32 %v906_v45, %v901_v37  ;;  %v3267_v1 = vperm.slane %v3266_v43, 0  ;;  %v1116_v54 = vmul.f32 %v3272_v32, %v3270_v35  ;;  %v3275_v37 = vld [vmem:[#allocation4_spill] sm:$0xff] }
 0x1fa   : > { %v2911_v19 = vadd.f32 %v880_v8, %v876_v27  ;;  %v2913_v61 = vadd.f32 %v881_v25, %v877_v58  ;;  %v1152_v27 = vmul.f32 %v1148_v44, %v3263_v22  ;;  %v3264_v58 = vld [vmem:[#allocation19_spill] sm:$0xff]  ;;  %v3269_v44 = vperm.slane %v3266_v43, 1 }
 0x1fb   : > { %v1153_v21 = vmul.f32 %v1149_v5, %v3264_v58  ;;  %v1008_v52 = vmul.f32 %v3267_v1, %v3265_v23  ;;  %v1117_v14 = vmul.f32 %v3274_v13, %v3273_v56  ;;  %vm832_vm15 = vcmp.lt.s32.totalorder %v3275_v37, 111 }
 0x1fc   : > { %v942_v62 = vpop.permute.xlu1 %941  ;;  %v1009_v63 = vmul.f32 %v3269_v44, %v3268_v6  ;;  %v840_v22 = vperm.slane %v1802_v60, 0  ;;  %vm1176_vm0 = vcmp.lt.s32.totalorder %v3275_v37, 94 }
 0x1fd   : > { %v948_v33 = vmul.f32 %v942_v62, %v936_v38  ;;  %v949_v41 = vmul.f32 %v942_v62, %v937_v31 }
 0x1fe   : > { %v1158_v55 = vpop.permute.xlu2 %1157 }
 0x1ff   : > { %v1204_v24 = vadd.f32 %v948_v33, %v912_v42  ;;  %v1205_v28 = vadd.f32 %v949_v41, %v913_v53  ;;  %v1164_v47 = vmul.f32 %v1158_v55, %v1152_v27  ;;  %v1165_v26 = vmul.f32 %v1158_v55, %v1153_v21  ;;  %v2960_v53 = vld [vmem:[%s3163_s8 + $0x17] ss:$8 sm:$0x3] }
 0x200   : > { %v829_v31 = vpop.permute.xlu0 %828  ;;  %v841_v27 = vperm.slane %v1802_v60, 1 }
 0x205   : > { %v1014_v48 = vpop.permute.xlu1 %1013 }
 0x206   : > { %v1020_v5 = vmul.f32 %v1014_v48, %v1008_v52  ;;  %v1021_v11 = vmul.f32 %v1014_v48, %v1009_v63  ;;  %v831_v40 = vpop.permute.xlu2 %830 }
 0x208   : > { %v1208_v45 = vadd.f32 %v1020_v5, %v984_v39  ;;  %v1209_v15 = vadd.f32 %v1021_v11, %v985_v29  ;;  %v854_v62 = vpop.permute.xlu0 %853 }
 0x20a   : > { %v1220_v0 = vadd.f32 %v1208_v45, %v1204_v24  ;;  %v1221_v50 = vadd.f32 %v1209_v15, %v1205_v28  ;;  %v1184_v24 = vperm.slane %v2960_v53, 0  ;;  %v1185_v28 = vperm.slane %v2960_v53, 1 }
 0x20e   : > { %v825_v2 = vpop.permute.xlu2 %824  ;;  %v1122_v20 = vpop.permute.xlu1 %1121 }
 0x20f   : > { %v1128_v16 = vmul.f32 %v1122_v20, %v1116_v54  ;;  %v1129_v8 = vmul.f32 %v1122_v20, %v1117_v14  ;;  %v835_v35 = vsel %vm832_vm15, %v829_v31, %v825_v2 }
 0x210   : > { %v845_v56 = vmul.f32 %v841_v27, %v835_v35 }
 0x211   : > { %v1216_v25 = vadd.f32 %v1164_v47, %v1128_v16  ;;  %v1217_v7 = vadd.f32 %v1165_v26, %v1129_v8  ;;  %v1346_v18 = vpop.permute.xlu0 %1345 }
 0x213   : > { %v1224_v57 = vadd.f32 %v1216_v25, %v1212_v46  ;;  %v1225_v39 = vadd.f32 %v1217_v7, %v1213_v10 }
 0x215   : > { %v2943_v29 = vadd.f32 %v1224_v57, %v1220_v0  ;;  %v2945_v38 = vadd.f32 %v1225_v39, %v1221_v50  ;;  %v833_v50 = vsel %vm832_vm15, %v825_v2, %v829_v31 }
 0x216   : > { %v2947_v4 = vpop.permute.xlu2 %1172  ;;  %v827_v3 = vpop.permute.xlu1 %826  ;;  %v844_v54 = vmul.f32 %v840_v22, %v833_v50 }
 0x217   : > { %v834_v46 = vsel %vm832_vm15, %v827_v3, %v831_v40  ;;  %v836_v10 = vsel %vm832_vm15, %v831_v40, %v827_v3 }
 0x218   : > { %v846_v58 = vmul.f32 %v840_v22, %v834_v46  ;;  %v847_v21 = vmul.f32 %v841_v27, %v836_v10 }
 0x21a   : > { %v858_v41 = vmul.f32 %v854_v62, %v846_v58  ;;  %v859_v55 = vmul.f32 %v854_v62, %v847_v21 }
 0x21c   : > { %v890_v23 = vadd.f32 %v2848_v34, %v858_v41  ;;  %v891_v43 = vadd.f32 %v2851_v51, %v859_v55 }
 0x21e   : > { %v850_v59 = vpop.permute.xlu2 %849  ;;  %v1175_v17 = vpop.permute.xlu1 %1174 }
 0x21f   : > { %v1178_v47 = vsel %vm1176_vm0, %v1171_v30, %v1175_v17  ;;  %v1180_v26 = vsel %vm1176_vm0, %v1175_v17, %v1171_v30  ;;  %v856_v16 = vmul.f32 %v850_v59, %v844_v54  ;;  %v857_v8 = vmul.f32 %v850_v59, %v845_v56  ;;  %v1250_v17 = vpop.permute.xlu0 %1249 }
 0x220   : > { %v1190_v1 = vmul.f32 %v1184_v24, %v1178_v47  ;;  %v1191_v52 = vmul.f32 %v1185_v28, %v1180_v26 }
 0x221   : > { %v888_v3 = vadd.f32 %v2911_v19, %v856_v16  ;;  %v889_v31 = vadd.f32 %v2913_v61, %v857_v8 }
 0x226   : > { %v1169_v42 = vpop.permute.xlu1 %1168 }
 0x227   : > { %v1242_v33 = vpop.permute.xlu2 %1241  ;;  %v1177_v10 = vsel %vm1176_vm0, %v1169_v42, %v2947_v4  ;;  %v1179_v22 = vsel %vm1176_vm0, %v2947_v4, %v1169_v42 }
 0x228   : > { %v1246_v44 = vmul.f32 %v1242_v33, %v890_v23  ;;  %v1247_v63 = vmul.f32 %v1242_v33, %v891_v43  ;;  %v1188_v58 = vmul.f32 %v1184_v24, %v1177_v10  ;;  %v1189_v33 = vmul.f32 %v1185_v28, %v1179_v22 }
 0x22e   : > { %v1198_v6 = vpop.permute.xlu1 %1197 }
 0x22f   : > { %v1202_v48 = vmul.f32 %v1198_v6, %v1190_v1  ;;  %v1203_v5 = vmul.f32 %v1198_v6, %v1191_v52 }
 0x230   : > { %v1254_v11 = vpop.permute.xlu2 %1253 }
 0x231   : > { %v2971_v40 = vadd.f32 %v1254_v11, %v1246_v44  ;;  %v2973_v45 = vadd.f32 %v1254_v11, %v1247_v63  ;;  %v1234_v34 = vadd.f32 %v2876_v49, %v1202_v48  ;;  %v1235_v51 = vadd.f32 %v2879_v9, %v1203_v5 }
 0x233   : > { %v1813_v15 = vmul.f32 -1.442695, %v2971_v40  ;;  %v1814_v0 = vmul.f32 -1.442695, %v2973_v45  ;;  %v1350_v13 = vmul.f32 %v1346_v18, %v1234_v34  ;;  %v1351_v14 = vmul.f32 %v1346_v18, %v1235_v51 }
 0x235   : > { %1955 = vpow2.f32 %v1813_v15 }
 0x236   : > { %1957 = vpow2.f32 %v1814_v0  ;;  %v1194_v32 = vpop.permute.xlu1 %1193 }
 0x237   : > { %v1200_v47 = vmul.f32 %v1194_v32, %v1188_v58  ;;  %v1201_v4 = vmul.f32 %v1194_v32, %v1189_v33 }
 0x239   : > { %v1358_v20 = vpop.permute.xlu2 %1357  ;;  %v1232_v5 = vadd.f32 %v2943_v29, %v1200_v47  ;;  %v1233_v0 = vadd.f32 %v2945_v38, %v1201_v4 }
 0x23a   : > { %v2983_v49 = vadd.f32 %v1358_v20, %v1350_v13  ;;  %v2985_v9 = vadd.f32 %v1358_v20, %v1351_v14 }
 0x23b   : > { %v1956_v25 = vpop.eup %1955 }
 0x23c   : > { %v1958_v7 = vpop.eup %1957  ;;  %v1274_v30 = vadd.f32 1.0, %v1956_v25  ;;  %v1817_v2 = vmul.f32 -1.442695, %v2983_v49  ;;  %v1818_v39 = vmul.f32 -1.442695, %v2985_v9 }
 0x23d   : > { %v2988_v57 = vadd.f32 1.0, %v1958_v7 }
 0x23e   : > { %1959 = vrcp.f32 %v1274_v30  ;;  %v1315_v1 = vand.u32 2147483647, %v1274_v30  ;;  %v1317_v52 = vand.u32 2147483648, %v1274_v30  ;;  %vm1311_vm3 = vweird.f32 %v1274_v30 }
 0x23f   : > { %1961 = vrcp.f32 %v2988_v57  ;;  %v1238_v59 = vpop.permute.xlu1 %1237  ;;  %v1332_v44 = vand.u32 2147483648, %v2988_v57  ;;  %v1330_v48 = vand.u32 2147483647, %v2988_v57  ;;  %vm1326_vm5 = vweird.f32 %v2988_v57 }
 0x240   : > { %1963 = vpow2.f32 %v1817_v2  ;;  %v1244_v60 = vmul.f32 %v1238_v59, %v888_v3  ;;  %v1245_v46 = vmul.f32 %v1238_v59, %v889_v31  ;;  %v1318_v34 = vor.u32 1.1754944e-38, %v1317_v52 }
 0x241   : > { %1965 = vpow2.f32 %v1818_v39  ;;  %vm1316_vm6 = vcmp.eq.f32.partialorder %v1315_v1, 8.507059e+37  ;;  %v1333_v32 = vor.u32 1.1754944e-38, %v1332_v44  ;;  %vm1331_vm8 = vcmp.eq.f32.partialorder %v1330_v48, 8.507059e+37 }
 0x242   : > { %v3000_v27 = vadd.f32 %v1250_v17, %v1244_v60  ;;  %v3002_v19 = vadd.f32 %v1250_v17, %v1245_v46 }
 0x244   : > { %v1960_v61 = vpop.eup %1959  ;;  %v1811_v21 = vmul.f32 -1.442695, %v3000_v27  ;;  %v1812_v62 = vmul.f32 -1.442695, %v3002_v19 }
 0x245   : > { %v1962_v53 = vpop.eup %1961  ;;  %v1307_v41 = vmul.f32 %v1960_v61, %v1274_v30  ;;  %vm1312_vm1 = vweird.f32 %v1960_v61 }
 0x246   : > { %v1964_v55 = vpop.eup %1963  ;;  %1967 = vpow2.f32 %v1811_v21  ;;  %v1322_v26 = vmul.f32 %v1962_v53, %v2988_v57  ;;  %vm1327_vm2 = vweird.f32 %v1962_v53  ;;  %vm1313_vm4 = vmor %vm1311_vm3, %vm1312_vm1 }
 0x247   : > { %v1966_v37 = vpop.eup %1965  ;;  %v3007_v42 = vadd.f32 1.0, %v1964_v55  ;;  %1969 = vpow2.f32 %v1812_v62  ;;  %v1308_v23 = vsub.f32 1.0, %v1307_v41  ;;  %vm1328_vm7 = vmor %vm1326_vm5, %vm1327_vm2  ;;  %v2061_v41 = vmov 256.0  }
 0x248   : > { %v3009_v43 = vadd.f32 1.0, %v1966_v37  ;;  %v1342_v24 = vpop.permute.xlu1 %1341  ;;  %v1323_v6 = vsub.f32 1.0, %v1322_v26 }
 0x249   : > { %1971 = vrcp.f32 %v3007_v42  ;;  %v1309_v28 = vmul.f32 %v1960_v61, %v1308_v23  ;;  %v1348_v38 = vmul.f32 %v1342_v24, %v1232_v5  ;;  %v1349_v8 = vmul.f32 %v1342_v24, %v1233_v0 }
 0x24a   : > { %1973 = vrcp.f32 %v3009_v43  ;;  %v1324_v63 = vmul.f32 %v1962_v53, %v1323_v6  ;;  %v1419_v2 = vand.u32 2147483647, %v3007_v42  ;;  %v1421_v57 = vand.u32 2147483648, %v3007_v42 }
 0x24b   : > { %v1310_v11 = vadd.f32 %v1960_v61, %v1309_v28  ;;  %v1434_v3 = vand.u32 2147483647, %v3009_v43  ;;  %vm1415_vm9 = vweird.f32 %v3007_v42  ;;  %vm1430_vm10 = vweird.f32 %v3009_v43 }
 0x24c   : > { %v1968_v15 = vpop.eup %1967  ;;  %v1325_v51 = vadd.f32 %v1962_v53, %v1324_v63  ;;  %v1436_v60 = vand.u32 2147483648, %v3009_v43  ;;  %vm3047_vm12 = vcmp.eq.f32.partialorder %v1419_v2, 8.507059e+37  ;;  %v1422_v21 = vor.u32 1.1754944e-38, %v1421_v57 }
 0x24d   : > { %v1970_v50 = vpop.eup %1969  ;;  %v3018_v35 = vadd.f32 1.0, %v1968_v15  ;;  %v1314_v18 = vsel %vm1313_vm4, %v1960_v61, %v1310_v11  ;;  %vm3051_vm14 = vcmp.eq.f32.partialorder %v1434_v3, 8.507059e+37 }
 0x24e   : > { %v3021_v54 = vadd.f32 1.0, %v1970_v50  ;;  %v1319_v29 = vsel %vm1316_vm6, %v1318_v34, %v1314_v18  ;;  %v1329_v56 = vsel %vm1328_vm7, %v1962_v53, %v1325_v51  ;;  %v1437_v26 = vor.u32 1.1754944e-38, %v1436_v60 }
 0x24f   : > { %v1972_v13 = vpop.eup %1971  ;;  %1975 = vrcp.f32 %v3018_v35  ;;  %v1334_v14 = vsel %vm1331_vm8, %v1333_v32, %v1329_v56  ;;  %v3025_v20 = vmul.f32 %v1319_v29, %v2971_v40  ;;  %v1285_v24 = vand.u32 2147483647, %v3018_v35 }
 0x250   : > { %v1974_v16 = vpop.eup %1973  ;;  %1977 = vrcp.f32 %v3021_v54  ;;  %v3029_v25 = vmul.f32 %v1334_v14, %v2973_v45  ;;  %v1411_v7 = vmul.f32 %v1972_v13, %v3007_v42  ;;  %vm1416_vm11 = vweird.f32 %v1972_v13 }
 0x251   : > { %v1354_v30 = vpop.permute.xlu1 %1353  ;;  %v1426_v39 = vmul.f32 %v1974_v16, %v3009_v43  ;;  %vm1431_vm13 = vweird.f32 %v1974_v16  ;;  %vm1417_vm15 = vmor %vm1415_vm9, %vm1416_vm11  ;;  %v1287_v1 = vand.u32 2147483648, %v3018_v35  ;;  %v1302_v42 = vand.u32 2147483648, %v3021_v54 }
 0x252   : > { %v3036_v40 = vadd.f32 %v1354_v30, %v1348_v38  ;;  %v3038_v31 = vadd.f32 %v1354_v30, %v1349_v8  ;;  %v1447_v59 = vadd.f32 %v3029_v25, %v3025_v20  ;;  %v1412_v45 = vsub.f32 1.0, %v1411_v7  ;;  %vm1432_vm0 = vmor %vm1430_vm10, %vm1431_vm13 }
 0x253   : > { %v1427_v17 = vsub.f32 1.0, %v1426_v39  ;;  %v1300_v11 = vand.u32 2147483647, %v3021_v54  ;;  %vm1281_vm3 = vweird.f32 %v3018_v35  ;;  %v1288_v34 = vor.u32 1.1754944e-38, %v1287_v1 }
 0x254   : > { %v1815_v46 = vmul.f32 -1.442695, %v3036_v40  ;;  %v1816_v10 = vmul.f32 -1.442695, %v3038_v31  ;;  %1448 = vadd.xlane.f32.xlu2 %v1447_v59  ;;  %v1413_v22 = vmul.f32 %v1972_v13, %v1412_v45  ;;  %vm1296_vm5 = vweird.f32 %v3021_v54 }
 0x255   : > { %v1976_v61 = vpop.eup %1975  ;;  %v1428_v62 = vmul.f32 %v1974_v16, %v1427_v17  ;;  %vm1286_vm6 = vcmp.eq.f32.partialorder %v1285_v24, 8.507059e+37  ;;  %v1303_v29 = vor.u32 1.1754944e-38, %v1302_v42  ;;  %vm1301_vm8 = vcmp.eq.f32.partialorder %v1300_v11, 8.507059e+37 }
 0x256   : > { %v1978_v53 = vpop.eup %1977  ;;  %1979 = vpow2.f32 %v1815_v46  ;;  %v1414_v33 = vadd.f32 %v1972_v13, %v1413_v22  ;;  %v1277_v55 = vmul.f32 %v1976_v61, %v3018_v35  ;;  %vm1282_vm1 = vweird.f32 %v1976_v61 }
 0x257   : > { %1981 = vpow2.f32 %v1816_v10  ;;  %v1429_v47 = vadd.f32 %v1974_v16, %v1428_v62  ;;  %v1292_v37 = vmul.f32 %v1978_v53, %v3021_v54  ;;  %vm1297_vm2 = vweird.f32 %v1978_v53  ;;  %vm1283_vm4 = vmor %vm1281_vm3, %vm1282_vm1 }
 0x258   : > { %v1418_v4 = vsel %vm1417_vm15, %v1972_v13, %v1414_v33  ;;  %v1278_v23 = vsub.f32 1.0, %v1277_v55  ;;  %vm1298_vm7 = vmor %vm1296_vm5, %vm1297_vm2  ;;  %vm1469_vm2 = vcmask 130048   ;;  %vm1534_vm3 = vcmask 1041408  }
 0x259   : > { %v1423_v52 = vsel %vm3047_vm12, %v1422_v21, %v1418_v4  ;;  %v1433_v6 = vsel %vm1432_vm0, %v1974_v16, %v1429_v47  ;;  %v1293_v28 = vsub.f32 1.0, %v1292_v37 }
 0x25a   : > { %v1438_v44 = vsel %vm3051_vm14, %v1437_v26, %v1433_v6  ;;  %v3069_v63 = vmul.f32 %v1423_v52, %v2983_v49  ;;  %v1279_v43 = vmul.f32 %v1976_v61, %v1278_v23 }
 0x25b   : > { %v3072_v48 = vmul.f32 %v1438_v44, %v2985_v9  ;;  %v1294_v5 = vmul.f32 %v1978_v53, %v1293_v28  ;;  %v1467_v28 = vld [vmem:[%s3158_s3] sm:$0x3] }
 0x25c   : > { %v1980_v15 = vpop.eup %1979  ;;  %v1280_v0 = vadd.f32 %v1976_v61, %v1279_v43  ;;  %v1468_v43 = vld [vmem:[%s3159_s4] sm:$0x3] }
 0x25d   : > { %v1982_v51 = vpop.eup %1981  ;;  %v1376_v50 = vadd.f32 1.0, %v1980_v15  ;;  %v1462_v49 = vadd.f32 %v3072_v48, %v3069_v63  ;;  %v1295_v18 = vadd.f32 %v1978_v53, %v1294_v5  ;;  %v1516_v15 = vld [vmem:[%s3162_s7] sm:$0x3] }
 0x25e   : > { %v1377_v9 = vadd.f32 1.0, %v1982_v51  ;;  %v1284_v32 = vsel %vm1283_vm4, %v1976_v61, %v1280_v0  ;;  %vm1527_vm4 = vcmask 15360  }
 0x25f   : > { %1983 = vrcp.f32 %v1376_v50  ;;  %1463 = vadd.xlane.f32.xlu1 %v1462_v49  ;;  %v1289_v56 = vsel %vm1286_vm6, %v1288_v34, %v1284_v32  ;;  %v1299_v35 = vsel %vm1298_vm7, %v1978_v53, %v1295_v18  ;;  %v1391_v57 = vand.u32 2147483648, %v1376_v50  ;;  %v1600_v49 = vld [vmem:[%s3161_s6 + $0x8] sm:$0xff] }
 0x260   : > { %1985 = vrcp.f32 %v1377_v9  ;;  %v1304_v13 = vsel %vm1301_vm8, %v1303_v29, %v1299_v35  ;;  %v3081_v38 = vmul.f32 %v1289_v56, %v3000_v27  ;;  %v1389_v59 = vand.u32 2147483647, %v1376_v50 }
 0x261   : > { %v3084_v14 = vmul.f32 %v1304_v13, %v3002_v19  ;;  %v1406_v45 = vand.u32 2147483648, %v1377_v9  ;;  %v1404_v17 = vand.u32 2147483647, %v1377_v9  ;;  %vm1385_vm11 = vweird.f32 %v1376_v50 }
 0x262   : > { %v1392_v60 = vor.u32 1.1754944e-38, %v1391_v57  ;;  %vm1400_vm13 = vweird.f32 %v1377_v9  ;;  %vm1390_vm14 = vcmp.eq.f32.partialorder %v1389_v59, 8.507059e+37  ;;  %1987 = vrcp.f32 %v2061_v41 }
 0x263   : > { %v1444_v54 = vadd.f32 %v3084_v14, %v3081_v38  ;;  %v1407_v22 = vor.u32 1.1754944e-38, %v1406_v45  ;;  %vm1405_vm0 = vcmp.eq.f32.partialorder %v1404_v17, 8.507059e+37 }
 0x265   : > { %v1984_v16 = vpop.eup %1983  ;;  %1445 = vadd.xlane.f32.xlu0 %v1444_v54 }
 0x266   : > { %v1986_v8 = vpop.eup %1985  ;;  %v1381_v7 = vmul.f32 %v1984_v16, %v1376_v50  ;;  %vm1386_vm9 = vweird.f32 %v1984_v16  ;;  %v1519_v50 = vld [vmem:[%s3160_s5] sm:$0xff] }
 0x267   : > { %v1396_v30 = vmul.f32 %v1986_v8, %v1377_v9  ;;  %vm1401_vm10 = vweird.f32 %v1986_v8  ;;  %vm1387_vm12 = vmor %vm1385_vm11, %vm1386_vm9 }
 0x268   : > { %v1382_v2 = vsub.f32 1.0, %v1381_v7  ;;  %vm1402_vm15 = vmor %vm1400_vm13, %vm1401_vm10  ;;  %v1988_v55 = vpop.eup %1987 }
 0x269   : > { %v1397_v39 = vsub.f32 1.0, %v1396_v30  ;;  %v1451_v47 = vmul.f32 256.0, %v1988_v55  ;;  %vm1455_vm1 = vweird.f32 %v1988_v55 }
 0x26a   : > { %v1383_v3 = vmul.f32 %v1984_v16, %v1382_v2 }
 0x26b   : > { %v1398_v27 = vmul.f32 %v1986_v8, %v1397_v39  ;;  %v1452_v26 = vsub.f32 1.0, %v1451_v47 }
 0x26c   : > { %v1384_v19 = vadd.f32 %v1984_v16, %v1383_v3 }
 0x26d   : > { %v1399_v46 = vadd.f32 %v1986_v8, %v1398_v27  ;;  %v1453_v37 = vmul.f32 %v1988_v55, %v1452_v26 }
 0x26e   : > { %v1388_v10 = vsel %vm1387_vm12, %v1984_v16, %v1384_v19 }
 0x26f   : > { %v1393_v61 = vsel %vm1390_vm14, %v1392_v60, %v1388_v10  ;;  %v1403_v58 = vsel %vm1402_vm15, %v1986_v8, %v1399_v46  ;;  %v1454_v4 = vadd.f32 %v1988_v55, %v1453_v37 }
 0x270   : > { %v1408_v21 = vsel %vm1405_vm0, %v1407_v22, %v1403_v58  ;;  %v3089_v62 = vmul.f32 %v1393_v61, %v3036_v40 }
 0x271   : > { %v3092_v53 = vmul.f32 %v1408_v21, %v3038_v31  ;;  %v1456_v23 = vsel %vm1455_vm1, %v1988_v55, %v1454_v4 }
 0x273   : > { %v1459_v33 = vadd.f32 %v3092_v53, %v3089_v62 }
 0x275   : > { %1460 = vadd.xlane.f32.xlu2 %v1459_v33 }
 0x278   : > { %1523 = vrot.lane.b32.xlu1 %v2777_v12, %s2063_s14 }
 0x279   : > { %1601 = vrot.lane.b32.xlu0 %v2748_v36, %s2062_s13 }
 0x28d   : > { %1521 = vrot.lane.b32.xlu2 %v2748_v36, %s2063_s14  ;;  %v1599_v36 = vld [vmem:[%s3161_s6] sm:$0xff] }
 0x295   : > { %1603 = vrot.lane.b32.xlu2 %v2777_v12, %s2062_s13  ;;  %v1520_v12 = vld [vmem:[%s3160_s5 + $0x8] sm:$0xff] }
 0x2c7   : > { %v1449_v24 = vpop.xlane.xlu2 %1448 }
 0x2c8   : > { %v1458_v1 = vmul.f32 %v1456_v23, %v1449_v24 }
 0x2ca   : > { %1510 = vmatpush.msra.mxu3 %v1458_v1 }
 0x2d2   : > { %v1464_v40 = vpop.xlane.xlu1 %1463 }
 0x2d3   : > { %v1466_v52 = vmul.f32 %v1464_v40, %v1456_v23 }
 0x2d5   : > { %1487 = vmatpush.msra.mxu2 %v1466_v52 }
 0x2d8   : > { %v1446_v31 = vpop.xlane.xlu0 %1445 }
 0x2d9   : > { %v1457_v6 = vmul.f32 %v1456_v23, %v1446_v31 }
 0x2db   : > { %1511 = vmatpush.msra.mxu3 %v1457_v6 }
 0x2dc   : > { %1820 = vmatmul.msk.f32.vlgmr.msra.gmra.mxu3 %vm1469_vm2, %v1467_v28 }
 0x2e8   : > { %v1461_v42 = vpop.xlane.xlu2 %1460 }
 0x2e9   : > { %v1465_v44 = vmul.f32 %v1461_v42, %v1456_v23 }
 0x2ea   : > { %v1524_v16 = vpop.permute.xlu1 %1523 }
 0x2eb   : > { %1488 = vmatpush.msra.mxu2 %v1465_v44  ;;  %v1602_v9 = vpop.permute.xlu0 %1601 }
 0x2ec   : > { %1819 = vmatmul.msk.f32.vlgmr.msra.gmra.mxu2 %vm1469_vm2, %v1468_v43 }
 0x2f0   : > { %v1522_v18 = vpop.permute.xlu2 %1521 }
 0x2f8   : > { %v1604_v8 = vpop.permute.xlu2 %1603 }
 0x35f   : > { %v1513_v5 = vpop.f32.mrf.mxu3 }
 0x36f   : > { %v1490_v11 = vpop.f32.mrf.mxu2 }
 0x370   : > { %v1514_v0 = vadd.f32 %v1513_v5, %v1490_v11 }
 0x372   : > { %v1517_v34 = vadd.f32 %v1516_v15, %v1514_v0 }
 0x374   : > { %v1518_v51 = vmax.f32 %v1517_v34, 0.0 }
 0x376   : > { %1821 = vmatpush.msk.msrb.mxu2 %vm1534_vm3, %v1518_v51  ;;  %1826 = vmatpush.msk.msrb.mxu3 %vm1534_vm3, %v1518_v51 }
 0x377   : > { %1822 = vmatmul.msk.f32.vlgmr.msrb.gmra.mxu2 %vm1527_vm4, %v1519_v50  ;;  %1827 = vmatmul.msk.f32.vlgmr.msrb.gmra.mxu3 %vm1527_vm4, %v1599_v36 }
 0x37f   : > { %1823 = vmatmul.msk.f32.gmra.mxu2 %vm1527_vm4, %v1520_v12  ;;  %1828 = vmatmul.msk.f32.gmra.mxu3 %vm1527_vm4, %v1600_v49 }
 0x3fa   : > { %v1555_v32 = vpop.f32.mrf.mxu2  ;;  %v1630_v29 = vpop.f32.mrf.mxu3 }
 0x3fb   : > { %v1631_v56 = vadd.f32 %v1630_v29, %v1602_v9  ;;  %v1556_v35 = vadd.f32 %v1555_v32, %v1522_v18 }
 0x3fd   : > { %v1829_v13 = vmul.f32 -1.442695, %v1631_v56  ;;  %v1824_v54 = vmul.f32 -1.442695, %v1556_v35 }
 0x3ff   : > { %1989 = vpow2.f32 %v1829_v13 }
 0x400   : > { %1991 = vpow2.f32 %v1824_v54 }
 0x402   : > { %v1558_v7 = vpop.f32.mrf.mxu2  ;;  %v1633_v30 = vpop.f32.mrf.mxu3 }
 0x403   : > { %v1559_v2 = vadd.f32 %v1558_v7, %v1524_v16  ;;  %v1634_v57 = vadd.f32 %v1633_v30, %v1604_v8  ;;  %v2007_v30 = vld [vmem:[%s2153_s24 + $0x20] sm:$0xff] }
 0x405   : > { %v1990_v39 = vpop.eup %1989  ;;  %v1825_v3 = vmul.f32 -1.442695, %v1559_v2  ;;  %v1830_v27 = vmul.f32 -1.442695, %v1634_v57  ;;  %v2008_v57 = vld [vmem:[%s2153_s24 + $0x28] sm:$0xff] }
 0x406   : > { %v1992_v59 = vpop.eup %1991  ;;  %v1642_v45 = vadd.f32 1.0, %v1990_v39 }
 0x407   : > { %v1567_v17 = vadd.f32 1.0, %v1992_v59  ;;  %1993 = vpow2.f32 %v1825_v3 }
 0x408   : > { %1995 = vrcp.f32 %v1642_v45  ;;  %v1653_v41 = vand.u32 2147483647, %v1642_v45  ;;  %v1655_v55 = vand.u32 2147483648, %v1642_v45  ;;  %vm1649_vm7 = vweird.f32 %v1642_v45 }
 0x409   : > { %1997 = vrcp.f32 %v1567_v17  ;;  %v1580_v37 = vand.u32 2147483648, %v1567_v17  ;;  %v1578_v23 = vand.u32 2147483647, %v1567_v17  ;;  %vm1574_vm9 = vweird.f32 %v1567_v17 }
 0x40a   : > { %1999 = vpow2.f32 %v1830_v27  ;;  %v1656_v40 = vor.u32 1.1754944e-38, %v1655_v55  ;;  %vm1654_vm10 = vcmp.eq.f32.partialorder %v1653_v41, 8.507059e+37  ;;  %v2010_v55 = vld [vmem:[%s2153_s24 + $0x38] sm:$0xff] }
 0x40b   : > { %v1581_v6 = vor.u32 1.1754944e-38, %v1580_v37  ;;  %vm1579_vm12 = vcmp.eq.f32.partialorder %v1578_v23, 8.507059e+37 }
 0x40d   : > { %v1994_v19 = vpop.eup %1993 }
 0x40e   : > { %v1996_v60 = vpop.eup %1995  ;;  %v1568_v46 = vadd.f32 1.0, %v1994_v19  ;;  %v1704_v19 = vld [vmem:[%s2153_s24 + $0x10] sm:$0xff] }
 0x40f   : > { %v1998_v10 = vpop.eup %1997  ;;  %v1645_v22 = vmul.f32 %v1996_v60, %v1642_v45  ;;  %vm1650_vm5 = vweird.f32 %v1996_v60 }
 0x410   : > { %v2000_v61 = vpop.eup %1999  ;;  %2001 = vrcp.f32 %v1568_v46  ;;  %v1570_v58 = vmul.f32 %v1998_v10, %v1567_v17  ;;  %vm1575_vm6 = vweird.f32 %v1998_v10  ;;  %vm1651_vm8 = vmor %vm1649_vm7, %vm1650_vm5  ;;  %v1595_v15 = vand.u32 2147483648, %v1568_v46 }
 0x411   : > { %v1643_v21 = vadd.f32 1.0, %v2000_v61  ;;  %v1646_v33 = vsub.f32 1.0, %v1645_v22  ;;  %vm1576_vm11 = vmor %vm1574_vm9, %vm1575_vm6  ;;  %v1593_v51 = vand.u32 2147483647, %v1568_v46  ;;  %vm1589_vm14 = vweird.f32 %v1568_v46 }
 0x412   : > { %v1571_v47 = vsub.f32 1.0, %v1570_v58  ;;  %v1596_v49 = vor.u32 1.1754944e-38, %v1595_v15 }
 0x413   : > { %2003 = vrcp.f32 %v1643_v21  ;;  %v1647_v26 = vmul.f32 %v1996_v60, %v1646_v33  ;;  %v1670_v12 = vand.u32 2147483648, %v1643_v21  ;;  %v1668_v9 = vand.u32 2147483647, %v1643_v21  ;;  %v2009_v33 = vld [vmem:[%s2153_s24 + $0x30] sm:$0xff] }
 0x414   : > { %v1572_v4 = vmul.f32 %v1998_v10, %v1571_v47  ;;  %vm1594_vm1 = vcmp.eq.f32.partialorder %v1593_v51, 8.507059e+37  ;;  %vm1664_vm2 = vweird.f32 %v1643_v21 }
 0x415   : > { %v1648_v24 = vadd.f32 %v1996_v60, %v1647_v26  ;;  %v1671_v35 = vor.u32 1.1754944e-38, %v1670_v12  ;;  %vm1669_vm4 = vcmp.eq.f32.partialorder %v1668_v9, 8.507059e+37 }
 0x416   : > { %v2002_v1 = vpop.eup %2001  ;;  %v1573_v52 = vadd.f32 %v1998_v10, %v1572_v4 }
 0x417   : > { %v1652_v31 = vsel %vm1651_vm8, %v1996_v60, %v1648_v24  ;;  %v1585_v28 = vmul.f32 %v2002_v1, %v1568_v46  ;;  %vm1590_vm13 = vweird.f32 %v2002_v1  ;;  %v1705_v60 = vld [vmem:[%s2153_s24 + $0x18] sm:$0xff] }
 0x418   : > { %v1657_v42 = vsel %vm1654_vm10, %v1656_v40, %v1652_v31  ;;  %v1577_v44 = vsel %vm1576_vm11, %v1998_v10, %v1573_v52  ;;  %vm1591_vm15 = vmor %vm1589_vm14, %vm1590_vm13 }
 0x419   : > { %v2004_v43 = vpop.eup %2003  ;;  %1690 = vperm.xlu2 %1938, %v1657_v42   ;;  %v1582_v5 = vsel %vm1579_vm12, %v1581_v6, %v1577_v44  ;;  %v1586_v11 = vsub.f32 1.0, %v1585_v28 }
 0x41a   : > { %1676 = vperm.xlu1 %1936, %v1582_v5   ;;  %v1660_v0 = vmul.f32 %v2004_v43, %v1643_v21  ;;  %vm1665_vm0 = vweird.f32 %v2004_v43 }
 0x41b   : > { %v1587_v34 = vmul.f32 %v2002_v1, %v1586_v11  ;;  %vm1666_vm3 = vmor %vm1664_vm2, %vm1665_vm0 }
 0x41c   : > { %v1661_v50 = vsub.f32 1.0, %v1660_v0 }
 0x41d   : > { %v1588_v36 = vadd.f32 %v2002_v1, %v1587_v34 }
 0x41e   : > { %v1662_v18 = vmul.f32 %v2004_v43, %v1661_v50 }
 0x41f   : > { %v1592_v32 = vsel %vm1591_vm15, %v2002_v1, %v1588_v36 }
 0x420   : > { %v1597_v29 = vsel %vm1594_vm1, %v1596_v49, %v1592_v32  ;;  %v1663_v56 = vadd.f32 %v2004_v43, %v1662_v18 }
 0x421   : > { %1681 = vperm.xlu0 %1937, %v1597_v29  }
 0x422   : > { %v1667_v13 = vsel %vm1666_vm3, %v2004_v43, %v1663_v56 }
 0x423   : > { %v1672_v54 = vsel %vm1669_vm4, %v1671_v35, %v1667_v13 }
 0x424   : > { %1695 = vperm.xlu1 %1936, %v1672_v54  }
 0x473   : > { %v1691_v16 = vpop.permute.xlu2 %1690 }
 0x474   : > { %v1698_v8 = vmul.f32 %v1691_v16, %v3089_v62  ;;  %v1699_v7 = vmul.f32 %v1691_v16, %v3092_v53  ;;  %v1702_v62 = vld [vmem:[%s2153_s24] sm:$0xff]  ;;  %v1703_v53 = vld [vmem:[%s2153_s24 + $0x8] sm:$0xff] }
 0x476   : > { %v1710_v2 = vadd.f32 %v2007_v30, %v1698_v8  ;;  %v1711_v39 = vadd.f32 %v2008_v57, %v1699_v7 }
 0x478   : > { %1718 = vst [vmem:[%s3128_s29 + $0x20] sm:$0xff] %v1710_v2 }
 0x479   : > { %1719 = vst [vmem:[%s3128_s29 + $0x28] sm:$0xff] %v1711_v39 }
 0x48c   : > { %v1677_v3 = vpop.permute.xlu1 %1676 }
 0x48d   : > { %v1684_v59 = vmul.f32 %v1677_v3, %v3081_v38  ;;  %v1685_v45 = vmul.f32 %v1677_v3, %v3084_v14 }
 0x48f   : > { %v1706_v27 = vadd.f32 %v1702_v62, %v1684_v59  ;;  %v1707_v17 = vadd.f32 %v1703_v53, %v1685_v45 }
 0x491   : > { %1714 = vst [vmem:[%s3128_s29] sm:$0xff] %v1706_v27 }
 0x492   : > { %1715 = vst [vmem:[%s3128_s29 + $0x8] sm:$0xff] %v1707_v17 }
 0x493   : > { %v1682_v46 = vpop.permute.xlu0 %1681 }
 0x494   : > { %v1686_v10 = vmul.f32 %v1682_v46, %v3025_v20  ;;  %v1687_v22 = vmul.f32 %v1682_v46, %v3029_v25 }
 0x496   : > { %v1708_v38 = vadd.f32 %v1704_v19, %v1686_v10  ;;  %v1709_v61 = vadd.f32 %v1705_v60, %v1687_v22  ;;  %v1696_v58 = vpop.permute.xlu1 %1695 }
 0x497   : > { %v1700_v14 = vmul.f32 %v1696_v58, %v3069_v63  ;;  %v1701_v21 = vmul.f32 %v1696_v58, %v3072_v48 }
 0x498   : > { %1716 = vst [vmem:[%s3128_s29 + $0x10] sm:$0xff] %v1708_v38 }
 0x499   : > { %1717 = vst [vmem:[%s3128_s29 + $0x18] sm:$0xff] %v1709_v61  ;;  %v1712_v41 = vadd.f32 %v2009_v33, %v1700_v14  ;;  %v1713_v47 = vadd.f32 %v2010_v55, %v1701_v21 }
 0x49b   : > { %1720 = vst [vmem:[%s3128_s29 + $0x30] sm:$0xff] %v1712_v41 }
 0x49c   : > { %1721 = vst [vmem:[%s3128_s29 + $0x38] sm:$0xff] %v1713_v47 }
 0x49d PF: > { %s21_s17 = sadd.s32 1, %s2017_s17  }
 0x49e   : > { %p18_p4 = scmp.ge.s32.totalorder %s21_s17, 4  }
 0x4a0   :  { %20 = sbr.rel (!%p18_p4) target bundleno = 1 (0x1), region = 109 }

</bundles_post_ra>
